<compile_context>
chip_gen: v7x
topology: tpu7x:2x2x1
jax: 0.10.0
libtpu: 0.0.40
codegen_flags: <defaults>
</compile_context>

<pallas_src>
import functools

import jax
import jax.numpy as jnp
from jax.experimental import pallas as pl
from jax.experimental.pallas import tpu as pltpu


def _down_kernel(xs_ref, w1_ref, b1_ref, w2_ref, b2_ref, out_ref,
                 a1_ref, a2_ref, *, Hb, Wp):
    Wpad = Wp + 2
    Lin = (Hb + 4) * Wpad            # pooled band incl. 2-row halo each side
    L1 = (Hb + 2) * Wpad             # conv1 rows computed (1-row halo each side)
    L2 = Hb * Wpad                   # final output rows of this band
    Cin = xs_ref.shape[-1]
    Coutp = out_ref.shape[-1]
    rows1 = a1_ref.shape[0]
    rows2 = a2_ref.shape[0]

    # ---- MaxPool2d(2): elementwise max of the four pre-strided views (bf16;
    # round-to-nearest is monotone, so pooling in bf16 == bf16(pooling in f32)).
    xp = jnp.maximum(jnp.maximum(xs_ref[0, 0, 0], xs_ref[1, 0, 0]),
                     jnp.maximum(xs_ref[2, 0, 0], xs_ref[3, 0, 0]))   # (Lin, Cin)

    # Stage the pooled band.  Halo rows / W-pad columns already arrive as zeros
    # from the wrapper, so only the small slack tail (read solely by taps that
    # feed masked-out columns) needs clearing.
    a1_ref[pl.ds(0, Lin), :] = xp
    a1_ref[pl.ds(Lin, rows1 - Lin), :] = jnp.zeros((rows1 - Lin, Cin),
                                                   a1_ref.dtype)

    # ---- Conv1 3x3 pad=1 (BN1 scale folded into w1): fused K = 9*Cin matmul.
    # Each tap is a contiguous row-slice of the flattened padded band; the 9
    # slices are lane-concatenated (im2col) so the MXU sees one deep-K matmul
    # instead of 9 shallow K=Cin passes.
    taps = [a1_ref[pl.ds(di * Wpad + dj, L1), :]
            for di in range(3) for dj in range(3)]
    lhs1 = jnp.concatenate(taps, axis=1)                       # (L1, 9*Cin) bf16
    acc1 = jnp.dot(lhs1, w1_ref[...], preferred_element_type=jnp.float32)
    h = jnp.maximum(acc1 + b1_ref[...], 0.0)                   # BN1 bias + ReLU

    # Rows that fall on a W-pad column must enter conv2 as zeros.
    col = jax.lax.broadcasted_iota(jnp.int32, (L1, 1), 0) % Wpad
    h = jnp.where(col < Wp, h, 0.0)

    # ---- Stage conv1 activations (bf16) into the second padded band buffer.
    a2_ref[pl.ds(0, 1), :] = jnp.zeros((1, Coutp), a2_ref.dtype)
    a2_ref[pl.ds(1, L1), :] = h.astype(a2_ref.dtype)
    a2_ref[pl.ds(1 + L1, rows2 - 1 - L1), :] = jnp.zeros(
        (rows2 - 1 - L1, Coutp), a2_ref.dtype)

    # Conv2's zero padding at the image top/bottom: conv1 halo rows that lie
    # outside the image must be zero, not whatever conv1 computed there.
    @pl.when(pl.program_id(1) == 0)
    def _():
        a2_ref[pl.ds(1, Wpad), :] = jnp.zeros((Wpad, Coutp), a2_ref.dtype)

    @pl.when(pl.program_id(1) == pl.num_programs(1) - 1)
    def _():
        a2_ref[pl.ds(1 + (Hb + 1) * Wpad, Wpad), :] = jnp.zeros(
            (Wpad, Coutp), a2_ref.dtype)

    # ---- Conv2 3x3 pad=1 (BN2 scale folded): 9 per-tap MXU accumulates.
    acc2 = jnp.zeros((L2, Coutp), jnp.float32)
    for di in range(3):
        for dj in range(3):
            lhs = a2_ref[pl.ds(di * Wpad + dj, L2), :]
            acc2 = acc2 + jnp.dot(lhs, w2_ref[di * 3 + dj],
                                  preferred_element_type=jnp.float32)
    y = jnp.maximum(acc2 + b2_ref[...], 0.0)                   # BN2 bias + ReLU

    # One dense lane-aligned (L2, Coutp) store per band.
    out_ref[0, 0] = y.astype(out_ref.dtype)


def _pick_band_rows(Hp, Wpad, Coutp, target_bytes=2 << 20):
    """Band height: largest divisor of Hp keeping the biggest f32 temp ~2 MiB."""
    hb = max(1, target_bytes // (Wpad * Coutp * 4) - 2)
    hb = min(hb, Hp)
    for d in range(hb, 0, -1):
        if Hp % d == 0:
            return d
    return Hp


def down_forward(x_nchw, w1, g1, be1, m1, v1, w2, g2, be2, m2, v2,
                 eps=1e-5, band_rows=None, out_dtype=jnp.float32):
    """x_nchw: (N, Cin, H, W) f32 -> (N, Cout, H//2, W//2) in `out_dtype`."""
    N, Cin, H, W = x_nchw.shape
    Cout = w1.shape[0]
    assert H % 2 == 0 and W % 2 == 0, "MaxPool2d(2) path assumes even H, W"
    Hp, Wp = H // 2, W // 2
    Wpad = Wp + 2
    Coutp = ((Cout + 127) // 128) * 128        # lane-dense output channels

    if band_rows is None:
        band_rows = _pick_band_rows(Hp, Wpad, Coutp)
    Hb = int(band_rows)
    assert Hp % Hb == 0, (Hp, Hb)
    NB = Hp // Hb
    Lin = (Hb + 4) * Wpad
    L1 = (Hb + 2) * Wpad
    L2 = Hb * Wpad
    K1 = 9 * Cin

    # Fold BN (inference semantics) into per-channel scale/bias, then fold the
    # scale into the conv weights so only bias + ReLU remain in-kernel.
    s1 = g1 / jnp.sqrt(v1 + eps)
    b1 = be1 - m1 * s1
    s2 = g2 / jnp.sqrt(v2 + eps)
    b2 = be2 - m2 * s2

    # Conv1 weight as im2col layout (9*Cin, Cout): row t*Cin+c = w1[o,c,di,dj],
    # t = di*3+dj, matching the in-kernel tap concatenation order.
    w1k = jnp.transpose(w1 * s1[:, None, None, None], (2, 3, 1, 0)).reshape(K1, Cout)
    w2k = jnp.transpose(w2 * s2[:, None, None, None], (2, 3, 1, 0)).reshape(9, Cout, Cout)
    w1k = jnp.pad(w1k, ((0, 0), (0, Coutp - Cout))).astype(jnp.bfloat16)
    w2k = jnp.pad(w2k, ((0, 0), (0, Coutp - Cout), (0, Coutp - Cout))).astype(jnp.bfloat16)
    b1p = jnp.pad(b1, (0, Coutp - Cout)).reshape(1, Coutp).astype(jnp.float32)
    b2p = jnp.pad(b2, (0, Coutp - Cout)).reshape(1, Coutp).astype(jnp.float32)

    # Single fused XLA prep pass: NCHW -> NHWC, stack the four 2x2 pooling
    # views, W-pad (1,1) and pooled-row-pad (2,2), cut overlapping row bands
    # with their 2-row halos, flatten each band, cast to bf16.
    x = jnp.transpose(x_nchw, (0, 2, 3, 1))
    xs4 = jnp.stack([x[:, 0::2, 0::2, :], x[:, 0::2, 1::2, :],
                     x[:, 1::2, 0::2, :], x[:, 1::2, 1::2, :]], axis=0)
    xs4 = jnp.pad(xs4, ((0, 0), (0, 0), (2, 2), (1, 1), (0, 0)))
    xs = jnp.stack([xs4[:, :, b * Hb:b * Hb + Hb + 4] for b in range(NB)], axis=2)
    xs = xs.reshape(4, N, NB, Lin, Cin).astype(jnp.bfloat16)

    kernel = functools.partial(_down_kernel, Hb=Hb, Wp=Wp)

    # Explicit VMEM budget: double-buffered blocks + scratch + f32 temps + slack.
    osz = jnp.dtype(out_dtype).itemsize
    est = (2 * (4 * Lin * Cin * 2)                                       # xs blocks
           + 2 * ((K1 * Coutp + 9 * Coutp * Coutp) * 2 + 2 * Coutp * 4)  # weights/bias
           + 2 * (L2 * Coutp * osz)                                      # out blocks
           + (Lin + 16) * Cin * 2 + (L1 + 17) * Coutp * 2                # a1 / a2
           + 2 * (L1 * K1 * 2 + (L1 + L2) * Coutp * 4))                  # lhs1 + temps
    vmem_limit = int(min(max(est + (8 << 20), 32 << 20), 96 << 20))

    out = pl.pallas_call(
        kernel,
        out_shape=jax.ShapeDtypeStruct((N, NB, L2, Coutp), out_dtype),
        grid_spec=pltpu.PrefetchScalarGridSpec(
            num_scalar_prefetch=0,
            grid=(N, NB),
            in_specs=[
                pl.BlockSpec((4, 1, 1, Lin, Cin), lambda n, b: (0, n, b, 0, 0)),
                pl.BlockSpec((K1, Coutp), lambda n, b: (0, 0)),
                pl.BlockSpec((1, Coutp), lambda n, b: (0, 0)),
                pl.BlockSpec((9, Coutp, Coutp), lambda n, b: (0, 0, 0)),
                pl.BlockSpec((1, Coutp), lambda n, b: (0, 0)),
            ],
            out_specs=pl.BlockSpec((1, 1, L2, Coutp), lambda n, b: (n, b, 0, 0)),
            scratch_shapes=[
                pltpu.VMEM((Lin + 16, Cin), jnp.bfloat16),     # padded pooled band
                pltpu.VMEM((L1 + 17, Coutp), jnp.bfloat16),    # padded conv1 band
            ],
        ),
        compiler_params=pltpu.CompilerParams(
            dimension_semantics=("parallel", "parallel"),
            vmem_limit_bytes=vmem_limit),
    )(xs, w1k, b1p, w2k, b2p)

    # (N, NB, Hb*Wpad, Coutp) -> strip W-pad columns & channel padding -> NCHW.
    out = out.reshape(N, Hp, Wpad, Coutp)[:, :, :Wp, :Cout]
    return jnp.transpose(out, (0, 3, 1, 2))


def down_reference(x, w1, g1, be1, m1, v1, w2, g2, be2, m2, v2, eps=1e-5):
    """Pure-JAX reference (NCHW, same inference-BN semantics)."""
    N, C, H, W = x.shape
    xp = jnp.max(x.reshape(N, C, H // 2, 2, W // 2, 2), axis=(3, 5))

    def conv_bn_relu(h, w, g, be, m, v):
        y = jax.lax.conv_general_dilated(
            h, w, window_strides=(1, 1), padding=[(1, 1), (1, 1)],
            dimension_numbers=("NCHW", "OIHW", "NCHW"),
            precision=jax.lax.Precision.HIGHEST)
        s = g / jnp.sqrt(v + eps)
        b = be - m * s
        y = y * s[None, :, None, None] + b[None, :, None, None]
        return jnp.maximum(y, 0.0)

    h = conv_bn_relu(xp, w1, g1, be1, m1, v1)
    return conv_bn_relu(h, w2, g2, be2, m2, v2)


if __name__ == "__main__":
    N, Cin, H, W = 2, 4, 16, 16
    Cout = 8

    key = jax.random.PRNGKey(0)
    ks = jax.random.split(key, 11)
    x = jax.random.normal(ks[0], (N, Cin, H, W), jnp.float32)

    w1 = 0.1 * jax.random.normal(ks[1], (Cout, Cin, 3, 3), jnp.float32)
    g1 = 1.0 + 0.1 * jax.random.normal(ks[2], (Cout,), jnp.float32)
    be1 = 0.1 * jax.random.normal(ks[3], (Cout,), jnp.float32)
    m1 = 0.05 * jax.random.normal(ks[4], (Cout,), jnp.float32)
    v1 = 1.0 + 0.2 * jax.random.uniform(ks[5], (Cout,), jnp.float32)

    w2 = 0.1 * jax.random.normal(ks[6], (Cout, Cout, 3, 3), jnp.float32)
    g2 = 1.0 + 0.1 * jax.random.normal(ks[7], (Cout,), jnp.float32)
    be2 = 0.1 * jax.random.normal(ks[8], (Cout,), jnp.float32)
    m2 = 0.05 * jax.random.normal(ks[9], (Cout,), jnp.float32)
    v2 = 1.0 + 0.2 * jax.random.uniform(ks[10], (Cout,), jnp.float32)

    ref = jax.block_until_ready(
        down_reference(x, w1, g1, be1, m1, v1, w2, g2, be2, m2, v2))

    # Multi-band path (2 row-bands of 4 pooled rows): exercises the halo slabs
    # and the first/last-band conv2 zero-padding logic.
    out = down_forward(x, w1, g1, be1, m1, v1, w2, g2, be2, m2, v2, band_rows=4)
    out = jax.block_until_ready(out)
    assert out.shape == (N, Cout, H // 2, W // 2), out.shape
    assert jnp.allclose(out, ref, rtol=2e-2, atol=2e-2), float(
        jnp.max(jnp.abs(out - ref)))

    # Auto band selection (single band at this toy size).
    out2 = jax.block_until_ready(
        down_forward(x, w1, g1, be1, m1, v1, w2, g2, be2, m2, v2))
    assert jnp.allclose(out2, ref, rtol=2e-2, atol=2e-2), float(
        jnp.max(jnp.abs(out2 - ref)))

    print("KERNEL_OK")
</pallas_src>

<mosaic_0001>
module attributes {stable_mosaic.version = 11 : i64} {
  func.func @_down_kernel(%arg0: i32, %arg1: i32, %arg2: memref<4x1x1x80x4xbf16, #tpu.memory_space<vmem>>, %arg3: memref<36x128xbf16, #tpu.memory_space<vmem>>, %arg4: memref<1x128xf32, #tpu.memory_space<vmem>>, %arg5: memref<9x128x128xbf16, #tpu.memory_space<vmem>>, %arg6: memref<1x128xf32, #tpu.memory_space<vmem>>, %arg7: memref<1x1x40x128xf32, #tpu.memory_space<vmem>>, %arg8: memref<96x4xbf16, #tpu.memory_space<vmem>>, %arg9: memref<77x128xbf16, #tpu.memory_space<vmem>>) attributes {dimension_semantics = [#tpu.dimension_semantics<parallel>, #tpu.dimension_semantics<parallel>], iteration_bounds = array<i64: 2, 2>, scalar_prefetch = 0 : i64, scratch_operands = 2 : i64, tpu.core_type = #tpu.core_type<tc>, window_params = [{transform_indices = @transform_0, window_bounds = array<i64: 4, 1, 1, 80, 4>}, {pipeline_mode = #tpu.pipeline_mode<synchronous>, transform_indices = @transform_1, window_bounds = array<i64: 36, 128>}, {pipeline_mode = #tpu.pipeline_mode<synchronous>, transform_indices = @transform_2, window_bounds = array<i64: 1, 128>}, {pipeline_mode = #tpu.pipeline_mode<synchronous>, transform_indices = @transform_3, window_bounds = array<i64: 9, 128, 128>}, {pipeline_mode = #tpu.pipeline_mode<synchronous>, transform_indices = @transform_4, window_bounds = array<i64: 1, 128>}, {transform_indices = @transform_5, window_bounds = array<i64: 1, 1, 40, 128>}]} {
    %c0 = arith.constant 0 : index
    %c0_0 = arith.constant 0 : index
    %c0_1 = arith.constant 0 : index
    %c0_2 = arith.constant 0 : index
    %c0_3 = arith.constant 0 : index
    %0 = vector.load %arg2[%c0, %c0_0, %c0_1, %c0_2, %c0_3] : memref<4x1x1x80x4xbf16, #tpu.memory_space<vmem>>, vector<1x1x1x80x4xbf16>
    %1 = vector.shape_cast %0 : vector<1x1x1x80x4xbf16> to vector<80x4xbf16>
    %c1 = arith.constant 1 : index
    %c0_4 = arith.constant 0 : index
    %c0_5 = arith.constant 0 : index
    %c0_6 = arith.constant 0 : index
    %c0_7 = arith.constant 0 : index
    %2 = vector.load %arg2[%c1, %c0_4, %c0_5, %c0_6, %c0_7] : memref<4x1x1x80x4xbf16, #tpu.memory_space<vmem>>, vector<1x1x1x80x4xbf16>
    %3 = vector.shape_cast %2 : vector<1x1x1x80x4xbf16> to vector<80x4xbf16>
    %4 = arith.maximumf %1, %3 : vector<80x4xbf16>
    %c2 = arith.constant 2 : index
    %c0_8 = arith.constant 0 : index
    %c0_9 = arith.constant 0 : index
    %c0_10 = arith.constant 0 : index
    %c0_11 = arith.constant 0 : index
    %5 = vector.load %arg2[%c2, %c0_8, %c0_9, %c0_10, %c0_11] : memref<4x1x1x80x4xbf16, #tpu.memory_space<vmem>>, vector<1x1x1x80x4xbf16>
    %6 = vector.shape_cast %5 : vector<1x1x1x80x4xbf16> to vector<80x4xbf16>
    %c3 = arith.constant 3 : index
    %c0_12 = arith.constant 0 : index
    %c0_13 = arith.constant 0 : index
    %c0_14 = arith.constant 0 : index
    %c0_15 = arith.constant 0 : index
    %7 = vector.load %arg2[%c3, %c0_12, %c0_13, %c0_14, %c0_15] : memref<4x1x1x80x4xbf16, #tpu.memory_space<vmem>>, vector<1x1x1x80x4xbf16>
    %8 = vector.shape_cast %7 : vector<1x1x1x80x4xbf16> to vector<80x4xbf16>
    %9 = arith.maximumf %6, %8 : vector<80x4xbf16>
    %10 = arith.maximumf %4, %9 : vector<80x4xbf16>
    %c0_16 = arith.constant 0 : index
    %c0_17 = arith.constant 0 : index
    %11 = vector.load %arg8[%c0_16, %c0_17] : memref<96x4xbf16, #tpu.memory_space<vmem>>, vector<80x4xbf16>
    tpu.vector_store %arg8[%c0_16, %c0_17], %10 {strides = array<i32>} : memref<96x4xbf16, #tpu.memory_space<vmem>>, vector<80x4xbf16>,
    %cst = arith.constant 0.000000e+00 : bf16
    %12 = vector.broadcast %cst : bf16 to vector<16x4xbf16>
    %c80 = arith.constant 80 : index
    %c0_18 = arith.constant 0 : index
    %13 = vector.load %arg8[%c80, %c0_18] : memref<96x4xbf16, #tpu.memory_space<vmem>>, vector<16x4xbf16>
    tpu.vector_store %arg8[%c80, %c0_18], %12 {strides = array<i32>} : memref<96x4xbf16, #tpu.memory_space<vmem>>, vector<16x4xbf16>,
    %c0_19 = arith.constant 0 : index
    %c0_20 = arith.constant 0 : index
    %14 = vector.load %arg8[%c0_19, %c0_20] : memref<96x4xbf16, #tpu.memory_space<vmem>>, vector<60x4xbf16>
    %c1_21 = arith.constant 1 : index
    %c0_22 = arith.constant 0 : index
    %15 = vector.load %arg8[%c1_21, %c0_22] : memref<96x4xbf16, #tpu.memory_space<vmem>>, vector<60x4xbf16>
    %c2_23 = arith.constant 2 : index
    %c0_24 = arith.constant 0 : index
    %16 = vector.load %arg8[%c2_23, %c0_24] : memref<96x4xbf16, #tpu.memory_space<vmem>>, vector<60x4xbf16>
    %c10 = arith.constant 10 : index
    %c0_25 = arith.constant 0 : index
    %17 = vector.load %arg8[%c10, %c0_25] : memref<96x4xbf16, #tpu.memory_space<vmem>>, vector<60x4xbf16>
    %c11 = arith.constant 11 : index
    %c0_26 = arith.constant 0 : index
    %18 = vector.load %arg8[%c11, %c0_26] : memref<96x4xbf16, #tpu.memory_space<vmem>>, vector<60x4xbf16>
    %c12 = arith.constant 12 : index
    %c0_27 = arith.constant 0 : index
    %19 = vector.load %arg8[%c12, %c0_27] : memref<96x4xbf16, #tpu.memory_space<vmem>>, vector<60x4xbf16>
    %c20 = arith.constant 20 : index
    %c0_28 = arith.constant 0 : index
    %20 = vector.load %arg8[%c20, %c0_28] : memref<96x4xbf16, #tpu.memory_space<vmem>>, vector<60x4xbf16>
    %c21 = arith.constant 21 : index
    %c0_29 = arith.constant 0 : index
    %21 = vector.load %arg8[%c21, %c0_29] : memref<96x4xbf16, #tpu.memory_space<vmem>>, vector<60x4xbf16>
    %c22 = arith.constant 22 : index
    %c0_30 = arith.constant 0 : index
    %22 = vector.load %arg8[%c22, %c0_30] : memref<96x4xbf16, #tpu.memory_space<vmem>>, vector<60x4xbf16>
    %23 = tpu.concatenate %14, %15, %16, %17, %18, %19, %20, %21, %22 in 1 : vector<60x4xbf16>, vector<60x4xbf16>, vector<60x4xbf16>, vector<60x4xbf16>, vector<60x4xbf16>, vector<60x4xbf16>, vector<60x4xbf16>, vector<60x4xbf16>, vector<60x4xbf16> -> vector<60x36xbf16>
    %c0_31 = arith.constant 0 : index
    %c0_32 = arith.constant 0 : index
    %24 = vector.load %arg3[%c0_31, %c0_32] : memref<36x128xbf16, #tpu.memory_space<vmem>>, vector<36x128xbf16>
    %cst_33 = arith.constant dense<0.000000e+00> : vector<60x128xf32>
    %25 = tpu.matmul %23, %24, %cst_33 {dimension_numbers = #tpu.dot_dimension_numbers<[1], [0], [0], [1], [0, 0, 1, 1], [], []>} : vector<60x36xbf16>, vector<36x128xbf16>, vector<60x128xf32> -> vector<60x128xf32>
    %c0_34 = arith.constant 0 : index
    %c0_35 = arith.constant 0 : index
    %26 = vector.load %arg4[%c0_34, %c0_35] : memref<1x128xf32, #tpu.memory_space<vmem>>, vector<1x128xf32>
    %27 = vector.broadcast %26 : vector<1x128xf32> to vector<60x128xf32>
    %28 = arith.addf %25, %27 : vector<60x128xf32>
    %cst_36 = arith.constant 0.000000e+00 : f32
    %29 = vector.broadcast %cst_36 : f32 to vector<60x128xf32>
    %30 = arith.maximumf %28, %29 : vector<60x128xf32>
    %31 = tpu.iota {dimensions = array<i32: 0>} : vector<60x1xi32>
    %c10_i32 = arith.constant 10 : i32
    %c0_i32 = arith.constant 0 : i32
    %32 = arith.cmpi eq, %c10_i32, %c0_i32 : i32
    %c1_i32 = arith.constant 1 : i32
    %33 = arith.select %32, %c1_i32, %c10_i32 : i32
    %34 = vector.broadcast %33 : i32 to vector<60x1xi32>
    %35 = arith.remsi %31, %34 : vector<60x1xi32>
    %c0_i32_37 = arith.constant 0 : i32
    %36 = vector.broadcast %c0_i32_37 : i32 to vector<60x1xi32>
    %37 = arith.cmpi ne, %35, %36 : vector<60x1xi32>
    %c0_i32_38 = arith.constant 0 : i32
    %38 = vector.broadcast %c0_i32_38 : i32 to vector<60x1xi32>
    %39 = arith.cmpi slt, %35, %38 : vector<60x1xi32>
    %c0_i32_39 = arith.constant 0 : i32
    %40 = arith.cmpi slt, %33, %c0_i32_39 : i32
    %41 = vector.broadcast %40 : i1 to vector<60x1xi1>
    %42 = vector.broadcast %41 : vector<60x1xi1> to vector<60x1xi1>
    %43 = arith.xori %39, %42 : vector<60x1xi1>
    %44 = arith.andi %43, %37 : vector<60x1xi1>
    %45 = vector.broadcast %33 : i32 to vector<60x1xi32>
    %46 = arith.addi %35, %45 : vector<60x1xi32>
    %47 = arith.select %44, %46, %35 : vector<60x1xi1>, vector<60x1xi32>
    %c8_i32 = arith.constant 8 : i32
    %48 = vector.broadcast %c8_i32 : i32 to vector<60x1xi32>
    %49 = arith.cmpi slt, %47, %48 : vector<60x1xi32>
    %cst_40 = arith.constant 0.000000e+00 : f32
    %50 = vector.shape_cast %49 : vector<60x1xi1> to vector<60x1xi1>
    %51 = vector.broadcast %50 : vector<60x1xi1> to vector<60x128xi1>
    %52 = vector.broadcast %cst_40 : f32 to vector<60x128xf32>
    %53 = arith.select %51, %30, %52 : vector<60x128xi1>, vector<60x128xf32>
    %cst_41 = arith.constant 0.000000e+00 : bf16
    %54 = vector.broadcast %cst_41 : bf16 to vector<1x128xbf16>
    %c0_42 = arith.constant 0 : index
    %c0_43 = arith.constant 0 : index
    %55 = vector.load %arg9[%c0_42, %c0_43] : memref<77x128xbf16, #tpu.memory_space<vmem>>, vector<1x128xbf16>
    tpu.vector_store %arg9[%c0_42, %c0_43], %54 {strides = array<i32>} : memref<77x128xbf16, #tpu.memory_space<vmem>>, vector<1x128xbf16>,
    %56 = arith.truncf %53 : vector<60x128xf32> to vector<60x128xbf16>
    %c1_44 = arith.constant 1 : index
    %c0_45 = arith.constant 0 : index
    %57 = vector.load %arg9[%c1_44, %c0_45] : memref<77x128xbf16, #tpu.memory_space<vmem>>, vector<60x128xbf16>
    tpu.vector_store %arg9[%c1_44, %c0_45], %56 {strides = array<i32>} : memref<77x128xbf16, #tpu.memory_space<vmem>>, vector<60x128xbf16>,
    %cst_46 = arith.constant 0.000000e+00 : bf16
    %58 = vector.broadcast %cst_46 : bf16 to vector<16x128xbf16>
    %c61 = arith.constant 61 : index
    %c0_47 = arith.constant 0 : index
    %59 = vector.load %arg9[%c61, %c0_47] : memref<77x128xbf16, #tpu.memory_space<vmem>>, vector<16x128xbf16>
    tpu.vector_store %arg9[%c61, %c0_47], %58 {strides = array<i32>} : memref<77x128xbf16, #tpu.memory_space<vmem>>, vector<16x128xbf16>,
    %c0_i32_48 = arith.constant 0 : i32
    %60 = arith.cmpi eq, %arg1, %c0_i32_48 : i32
    %61 = arith.extui %60 : i1 to i32
    %c0_i32_49 = arith.constant 0 : i32
    %62 = arith.cmpi ne, %61, %c0_i32_49 : i32
    scf.if %62 {
      %cst_109 = arith.constant 0.000000e+00 : bf16
      %120 = vector.broadcast %cst_109 : bf16 to vector<10x128xbf16>
      %c1_110 = arith.constant 1 : index
      %c0_111 = arith.constant 0 : index
      %121 = vector.load %arg9[%c1_110, %c0_111] : memref<77x128xbf16, #tpu.memory_space<vmem>>, vector<10x128xbf16>
      tpu.vector_store %arg9[%c1_110, %c0_111], %120 {strides = array<i32>} : memref<77x128xbf16, #tpu.memory_space<vmem>>, vector<10x128xbf16>,
    } else {
    }
    %c1_i32_50 = arith.constant 1 : i32
    %63 = arith.cmpi eq, %arg1, %c1_i32_50 : i32
    %64 = arith.extui %63 : i1 to i32
    %c0_i32_51 = arith.constant 0 : i32
    %65 = arith.cmpi ne, %64, %c0_i32_51 : i32
    scf.if %65 {
      %cst_109 = arith.constant 0.000000e+00 : bf16
      %120 = vector.broadcast %cst_109 : bf16 to vector<10x128xbf16>
      %c51 = arith.constant 51 : index
      %c0_110 = arith.constant 0 : index
      %121 = vector.load %arg9[%c51, %c0_110] : memref<77x128xbf16, #tpu.memory_space<vmem>>, vector<10x128xbf16>
      tpu.vector_store %arg9[%c51, %c0_110], %120 {strides = array<i32>} : memref<77x128xbf16, #tpu.memory_space<vmem>>, vector<10x128xbf16>,
    } else {
    }
    %cst_52 = arith.constant 0.000000e+00 : f32
    %66 = vector.broadcast %cst_52 : f32 to vector<40x128xf32>
    %c0_53 = arith.constant 0 : index
    %c0_54 = arith.constant 0 : index
    %67 = vector.load %arg9[%c0_53, %c0_54] : memref<77x128xbf16, #tpu.memory_space<vmem>>, vector<40x128xbf16>
    %c0_55 = arith.constant 0 : index
    %c0_56 = arith.constant 0 : index
    %c0_57 = arith.constant 0 : index
    %68 = vector.load %arg5[%c0_55, %c0_56, %c0_57] : memref<9x128x128xbf16, #tpu.memory_space<vmem>>, vector<1x128x128xbf16>
    %69 = vector.shape_cast %68 : vector<1x128x128xbf16> to vector<128x128xbf16>
    %cst_58 = arith.constant dense<0.000000e+00> : vector<40x128xf32>
    %70 = tpu.matmul %67, %69, %cst_58 {dimension_numbers = #tpu.dot_dimension_numbers<[1], [0], [0], [1], [0, 0, 1, 1], [], []>} : vector<40x128xbf16>, vector<128x128xbf16>, vector<40x128xf32> -> vector<40x128xf32>
    %71 = arith.addf %66, %70 : vector<40x128xf32>
    %c1_59 = arith.constant 1 : index
    %c0_60 = arith.constant 0 : index
    %72 = vector.load %arg9[%c1_59, %c0_60] : memref<77x128xbf16, #tpu.memory_space<vmem>>, vector<40x128xbf16>
    %c1_61 = arith.constant 1 : index
    %c0_62 = arith.constant 0 : index
    %c0_63 = arith.constant 0 : index
    %73 = vector.load %arg5[%c1_61, %c0_62, %c0_63] : memref<9x128x128xbf16, #tpu.memory_space<vmem>>, vector<1x128x128xbf16>
    %74 = vector.shape_cast %73 : vector<1x128x128xbf16> to vector<128x128xbf16>
    %cst_64 = arith.constant dense<0.000000e+00> : vector<40x128xf32>
    %75 = tpu.matmul %72, %74, %cst_64 {dimension_numbers = #tpu.dot_dimension_numbers<[1], [0], [0], [1], [0, 0, 1, 1], [], []>} : vector<40x128xbf16>, vector<128x128xbf16>, vector<40x128xf32> -> vector<40x128xf32>
    %76 = arith.addf %71, %75 : vector<40x128xf32>
    %c2_65 = arith.constant 2 : index
    %c0_66 = arith.constant 0 : index
    %77 = vector.load %arg9[%c2_65, %c0_66] : memref<77x128xbf16, #tpu.memory_space<vmem>>, vector<40x128xbf16>
    %c2_67 = arith.constant 2 : index
    %c0_68 = arith.constant 0 : index
    %c0_69 = arith.constant 0 : index
    %78 = vector.load %arg5[%c2_67, %c0_68, %c0_69] : memref<9x128x128xbf16, #tpu.memory_space<vmem>>, vector<1x128x128xbf16>
    %79 = vector.shape_cast %78 : vector<1x128x128xbf16> to vector<128x128xbf16>
    %cst_70 = arith.constant dense<0.000000e+00> : vector<40x128xf32>
    %80 = tpu.matmul %77, %79, %cst_70 {dimension_numbers = #tpu.dot_dimension_numbers<[1], [0], [0], [1], [0, 0, 1, 1], [], []>} : vector<40x128xbf16>, vector<128x128xbf16>, vector<40x128xf32> -> vector<40x128xf32>
    %81 = arith.addf %76, %80 : vector<40x128xf32>
    %c10_71 = arith.constant 10 : index
    %c0_72 = arith.constant 0 : index
    %82 = vector.load %arg9[%c10_71, %c0_72] : memref<77x128xbf16, #tpu.memory_space<vmem>>, vector<40x128xbf16>
    %c3_73 = arith.constant 3 : index
    %c0_74 = arith.constant 0 : index
    %c0_75 = arith.constant 0 : index
    %83 = vector.load %arg5[%c3_73, %c0_74, %c0_75] : memref<9x128x128xbf16, #tpu.memory_space<vmem>>, vector<1x128x128xbf16>
    %84 = vector.shape_cast %83 : vector<1x128x128xbf16> to vector<128x128xbf16>
    %cst_76 = arith.constant dense<0.000000e+00> : vector<40x128xf32>
    %85 = tpu.matmul %82, %84, %cst_76 {dimension_numbers = #tpu.dot_dimension_numbers<[1], [0], [0], [1], [0, 0, 1, 1], [], []>} : vector<40x128xbf16>, vector<128x128xbf16>, vector<40x128xf32> -> vector<40x128xf32>
    %86 = arith.addf %81, %85 : vector<40x128xf32>
    %c11_77 = arith.constant 11 : index
    %c0_78 = arith.constant 0 : index
    %87 = vector.load %arg9[%c11_77, %c0_78] : memref<77x128xbf16, #tpu.memory_space<vmem>>, vector<40x128xbf16>
    %c4 = arith.constant 4 : index
    %c0_79 = arith.constant 0 : index
    %c0_80 = arith.constant 0 : index
    %88 = vector.load %arg5[%c4, %c0_79, %c0_80] : memref<9x128x128xbf16, #tpu.memory_space<vmem>>, vector<1x128x128xbf16>
    %89 = vector.shape_cast %88 : vector<1x128x128xbf16> to vector<128x128xbf16>
    %cst_81 = arith.constant dense<0.000000e+00> : vector<40x128xf32>
    %90 = tpu.matmul %87, %89, %cst_81 {dimension_numbers = #tpu.dot_dimension_numbers<[1], [0], [0], [1], [0, 0, 1, 1], [], []>} : vector<40x128xbf16>, vector<128x128xbf16>, vector<40x128xf32> -> vector<40x128xf32>
    %91 = arith.addf %86, %90 : vector<40x128xf32>
    %c12_82 = arith.constant 12 : index
    %c0_83 = arith.constant 0 : index
    %92 = vector.load %arg9[%c12_82, %c0_83] : memref<77x128xbf16, #tpu.memory_space<vmem>>, vector<40x128xbf16>
    %c5 = arith.constant 5 : index
    %c0_84 = arith.constant 0 : index
    %c0_85 = arith.constant 0 : index
    %93 = vector.load %arg5[%c5, %c0_84, %c0_85] : memref<9x128x128xbf16, #tpu.memory_space<vmem>>, vector<1x128x128xbf16>
    %94 = vector.shape_cast %93 : vector<1x128x128xbf16> to vector<128x128xbf16>
    %cst_86 = arith.constant dense<0.000000e+00> : vector<40x128xf32>
    %95 = tpu.matmul %92, %94, %cst_86 {dimension_numbers = #tpu.dot_dimension_numbers<[1], [0], [0], [1], [0, 0, 1, 1], [], []>} : vector<40x128xbf16>, vector<128x128xbf16>, vector<40x128xf32> -> vector<40x128xf32>
    %96 = arith.addf %91, %95 : vector<40x128xf32>
    %c20_87 = arith.constant 20 : index
    %c0_88 = arith.constant 0 : index
    %97 = vector.load %arg9[%c20_87, %c0_88] : memref<77x128xbf16, #tpu.memory_space<vmem>>, vector<40x128xbf16>
    %c6 = arith.constant 6 : index
    %c0_89 = arith.constant 0 : index
    %c0_90 = arith.constant 0 : index
    %98 = vector.load %arg5[%c6, %c0_89, %c0_90] : memref<9x128x128xbf16, #tpu.memory_space<vmem>>, vector<1x128x128xbf16>
    %99 = vector.shape_cast %98 : vector<1x128x128xbf16> to vector<128x128xbf16>
    %cst_91 = arith.constant dense<0.000000e+00> : vector<40x128xf32>
    %100 = tpu.matmul %97, %99, %cst_91 {dimension_numbers = #tpu.dot_dimension_numbers<[1], [0], [0], [1], [0, 0, 1, 1], [], []>} : vector<40x128xbf16>, vector<128x128xbf16>, vector<40x128xf32> -> vector<40x128xf32>
    %101 = arith.addf %96, %100 : vector<40x128xf32>
    %c21_92 = arith.constant 21 : index
    %c0_93 = arith.constant 0 : index
    %102 = vector.load %arg9[%c21_92, %c0_93] : memref<77x128xbf16, #tpu.memory_space<vmem>>, vector<40x128xbf16>
    %c7 = arith.constant 7 : index
    %c0_94 = arith.constant 0 : index
    %c0_95 = arith.constant 0 : index
    %103 = vector.load %arg5[%c7, %c0_94, %c0_95] : memref<9x128x128xbf16, #tpu.memory_space<vmem>>, vector<1x128x128xbf16>
    %104 = vector.shape_cast %103 : vector<1x128x128xbf16> to vector<128x128xbf16>
    %cst_96 = arith.constant dense<0.000000e+00> : vector<40x128xf32>
    %105 = tpu.matmul %102, %104, %cst_96 {dimension_numbers = #tpu.dot_dimension_numbers<[1], [0], [0], [1], [0, 0, 1, 1], [], []>} : vector<40x128xbf16>, vector<128x128xbf16>, vector<40x128xf32> -> vector<40x128xf32>
    %106 = arith.addf %101, %105 : vector<40x128xf32>
    %c22_97 = arith.constant 22 : index
    %c0_98 = arith.constant 0 : index
    %107 = vector.load %arg9[%c22_97, %c0_98] : memref<77x128xbf16, #tpu.memory_space<vmem>>, vector<40x128xbf16>
    %c8 = arith.constant 8 : index
    %c0_99 = arith.constant 0 : index
    %c0_100 = arith.constant 0 : index
    %108 = vector.load %arg5[%c8, %c0_99, %c0_100] : memref<9x128x128xbf16, #tpu.memory_space<vmem>>, vector<1x128x128xbf16>
    %109 = vector.shape_cast %108 : vector<1x128x128xbf16> to vector<128x128xbf16>
    %cst_101 = arith.constant dense<0.000000e+00> : vector<40x128xf32>
    %110 = tpu.matmul %107, %109, %cst_101 {dimension_numbers = #tpu.dot_dimension_numbers<[1], [0], [0], [1], [0, 0, 1, 1], [], []>} : vector<40x128xbf16>, vector<128x128xbf16>, vector<40x128xf32> -> vector<40x128xf32>
    %111 = arith.addf %106, %110 : vector<40x128xf32>
    %c0_102 = arith.constant 0 : index
    %c0_103 = arith.constant 0 : index
    %112 = vector.load %arg6[%c0_102, %c0_103] : memref<1x128xf32, #tpu.memory_space<vmem>>, vector<1x128xf32>
    %113 = vector.broadcast %112 : vector<1x128xf32> to vector<40x128xf32>
    %114 = arith.addf %111, %113 : vector<40x128xf32>
    %cst_104 = arith.constant 0.000000e+00 : f32
    %115 = vector.broadcast %cst_104 : f32 to vector<40x128xf32>
    %116 = arith.maximumf %114, %115 : vector<40x128xf32>
    %c0_105 = arith.constant 0 : index
    %c0_106 = arith.constant 0 : index
    %c0_107 = arith.constant 0 : index
    %c0_108 = arith.constant 0 : index
    %117 = vector.load %arg7[%c0_105, %c0_106, %c0_107, %c0_108] : memref<1x1x40x128xf32, #tpu.memory_space<vmem>>, vector<1x1x40x128xf32>
    %118 = vector.shape_cast %117 : vector<1x1x40x128xf32> to vector<40x128xf32>
    %119 = vector.shape_cast %116 : vector<40x128xf32> to vector<1x1x40x128xf32>
    tpu.vector_store %arg7[%c0_105, %c0_106, %c0_107, %c0_108], %119 {strides = array<i32>} : memref<1x1x40x128xf32, #tpu.memory_space<vmem>>, vector<1x1x40x128xf32>,
    return
  }
  func.func @transform_0(%arg0: i32, %arg1: i32) -> (i32, i32, i32, i32, i32) {
    %c0_i32 = arith.constant 0 : i32
    %c0_i32_0 = arith.constant 0 : i32
    %c0_i32_1 = arith.constant 0 : i32
    %c0_i32_2 = arith.constant 0 : i32
    return %c0_i32, %arg0, %arg1, %c0_i32_0, %c0_i32_1 : i32, i32, i32, i32, i32
  }
  func.func @transform_1(%arg0: i32, %arg1: i32) -> (i32, i32) {
    %c0_i32 = arith.constant 0 : i32
    %c0_i32_0 = arith.constant 0 : i32
    %c0_i32_1 = arith.constant 0 : i32
    return %c0_i32, %c0_i32_0 : i32, i32
  }
  func.func @transform_2(%arg0: i32, %arg1: i32) -> (i32, i32) {
    %c0_i32 = arith.constant 0 : i32
    %c0_i32_0 = arith.constant 0 : i32
    %c0_i32_1 = arith.constant 0 : i32
    return %c0_i32, %c0_i32_0 : i32, i32
  }
  func.func @transform_3(%arg0: i32, %arg1: i32) -> (i32, i32, i32) {
    %c0_i32 = arith.constant 0 : i32
    %c0_i32_0 = arith.constant 0 : i32
    %c0_i32_1 = arith.constant 0 : i32
    %c0_i32_2 = arith.constant 0 : i32
    return %c0_i32, %c0_i32_0, %c0_i32_1 : i32, i32, i32
  }
  func.func @transform_4(%arg0: i32, %arg1: i32) -> (i32, i32) {
    %c0_i32 = arith.constant 0 : i32
    %c0_i32_0 = arith.constant 0 : i32
    %c0_i32_1 = arith.constant 0 : i32
    return %c0_i32, %c0_i32_0 : i32, i32
  }
  func.func @transform_5(%arg0: i32, %arg1: i32) -> (i32, i32, i32, i32) {
    %c0_i32 = arith.constant 0 : i32
    %c0_i32_0 = arith.constant 0 : i32
    %c0_i32_1 = arith.constant 0 : i32
    return %arg0, %arg1, %c0_i32, %c0_i32_0 : i32, i32, i32, i32
  }
}

</mosaic_0001>

<bundles_post_ra>
// kernel: tpu_custom_call.1
= control target key start
LH: loop header
LB: loop body
LE: loop exit
PB: predicated region body
PF: predicated region fallthrough
CT: control target
= control target key end

     0   :  { %10 = vsyncpa [#allocation6], 0  ;;  %s4786_s0 = inlined_call_operand.vmem [shape: bf16[4,2,2,80,4], index: 0, kind: input, shape index: {}]   ;;  %s4787_s1 = inlined_call_operand.vmem [shape: bf16[36,128], index: 1, kind: input, shape index: {}]   ;;  %s4788_s2 = inlined_call_operand.vmem [shape: f32[1,128], index: 2, kind: input, shape index: {}]   ;;  %s4789_s3 = inlined_call_operand.vmem [shape: bf16[9,128,128], index: 3, kind: input, shape index: {}]   ;;  %s4790_s4 = inlined_call_operand.vmem [shape: f32[1,128], index: 4, kind: input, shape index: {}]   ;;  %s4791_s5 = inlined_call_operand.hbm [shape: f32[2,2,40,128], index: 5, kind: output, shape index: {}]  }
   0x1   :  { %12 = vsyncpa [#allocation6 + $0x1], 0  ;;  %s3753_s18 = smov 0   ;;  %s3755_s19 = smov 0  }
   0x2   :  { %s3757_s20 = smov 0   ;;  %s3759_s21 = smov 0  }
   0x3   :  { %s3761_s22 = smov 0   ;;  %s3763_s23 = smov 0  }
   0x4   :  { %s3765_s24 = smov 0   ;;  %s3767_s25 = smov 0  }
   0x5 LB: > { %s2759_s26 = sadd.s32 4294967295, %s3708_s25   ;;  %s2760_s27 = sadd.s32 4294967294, %s3708_s25   ;;  %s3708_s25 = sphi %s3767_s25, %s18_s25   ;;  %s3704_s24 = sphi %s3765_s24, %s4846_s24   ;;  %s3700_s23 = sphi %s3763_s23, %s4845_s23   ;;  %s3696_s22 = sphi %s3761_s22, %s4844_s22   ;;  %s3692_s21 = sphi %s3759_s21, %s4843_s21   ;;  %s3688_s20 = sphi %s3757_s20, %s4842_s20   ;;  %s3684_s19 = sphi %s3755_s19, %s4841_s19   ;;  %s3680_s18 = sphi %s3753_s18, %s4840_s18  }
   0x6   : > { %s27_s28 = sadd.s32 1, %s3700_s23  ;;  %s30_s29 = sadd.s32 1, %s3704_s24 }
   0x7   : > { %p28_p0 = scmp.ge.s32.totalorder %s27_s28, 2  ;;  %p46_p1 = scmp.ne.s32.totalorder %s3688_s20, %s3684_s19 }
   0x8   : > { %p47_p2 = scmp.eq.s32.totalorder %s3708_s25, 0  ;;  %p162_p5 = scmp.eq.s32.totalorder %s2759_s26, 3 }
   0x9   : > { %s4848_s28 = smov (%p28_p0, %s27_s28), 0  ;;  %s4850_s29 = smov (!%p28_p0, %s30_s29), %s3704_s24 }
   0xa   : > { %s35_s30 = ssub.s32 %s3700_s23, %s4848_s28  ;;  %p3805_p3 = por %p47_p2, %p46_p1 }
   0xb   : > { %p32_p4 = scmp.ge.s32.totalorder %s4850_s29, 2  ;;  %p167_p6 = scmp.ne.s32.totalorder %s3684_s19, %s3680_s18 }
   0xc   : > { %p168_p7 = scmp.eq.s32.totalorder %s2760_s27, 3  ;;  %p3813_p8 = por %p162_p5, %p46_p1 }
   0xd   : > { %s4852_s29 = smov (%p32_p4, %s4850_s29), 0  ;;  %s39_s11 = sadd.s32 1, %s3688_s20 }
   0xe   : > { %p3817_p9 = por %p168_p7, %p167_p6  ;;  %s34_s9 = ssub.s32 %s3704_s24, %s4852_s29 }
   0xf   : > { %s36_s10 = sor.u32 %s35_s30, %s34_s9  ;;  %p2762_p11 = scmp.ge.s32.totalorder %s3708_s25, 4 }
  0x10   : > { %p37_p10 = scmp.eq.s32.totalorder %s36_s10, 0 }
  0x11   : > { %196 = sbr.rel (%p2762_p11) target bundleno = 43 (0x2b), region = 32 }
  0x12   : > { %s3825_s12 = scalar_select %p37_p10, %s3688_s20, %s39_s11  }
  0x18   : > { %199 = sbr.rel (!%p3805_p3) target bundleno = 43 (0x2b), region = 36  ;;  %s201_s13 = sand.u32 (%p3805_p3), 1, %s3688_s20  }
  0x19   : > { %s3419_s14 = smul.u32 (%p3805_p3), 10, %s3700_s23 }
  0x1a   : > { %s3418_s15 = smul.u32 (%p3805_p3), 160, %s201_s13 }
  0x1b   : > { %s3420_s16 = smul.u32 (%p3805_p3), 20, %s3704_s24 }
  0x1c   : > { %s3841_s6 = scalar_lea.vmem (%p3805_p3), [#allocation4], %s3418_s15 }
  0x1d   : > { %s206_s17 = sadd.s32 (%p3805_p3), %s3420_s16, %s3419_s14 }
  0x1e   : > { %s2763_s26 = sshll.u32 (%p3805_p3), %s206_s17, 2 }
  0x1f   : > { %s3836_s9 = scalar_lea.vmem %s4786_s0, %s2763_s26 }
  0x20   : > { %v224_v0 = vld [vmem:[%s3836_s9] sm:$0xff]   ;;  %v228_v1 = vld [vmem:[%s3836_s9 + $0x8] sm:$0xff]   ;;  %v232_v2 = vld [vmem:[%s3836_s9 + $0x10] sm:$0xff]  }
  0x21   : > { %225 = vst [vmem:[%s3841_s6] sm:$0xff] %v224_v0   ;;  %229 = vst [vmem:[%s3841_s6 + $0x8] sm:$0xff] %v228_v1   ;;  %v236_v3 = vld [vmem:[%s3836_s9 + $0x18] sm:$0xff]   ;;  %v240_v4 = vld [vmem:[%s3836_s9 + $0x20] sm:$0xff]  }
  0x22   : > { %233 = vst [vmem:[%s3841_s6 + $0x10] sm:$0xff] %v232_v2   ;;  %v244_v5 = vld [vmem:[%s3836_s9 + $0xa0] sm:$0xff]   ;;  %237 = vst [vmem:[%s3841_s6 + $0x18] sm:$0xff] %v236_v3   ;;  %v248_v6 = vld [vmem:[%s3836_s9 + $0xa8] sm:$0xff]  }
  0x23   : > { %241 = vst [vmem:[%s3841_s6 + $0x20] sm:$0xff] %v240_v4   ;;  %245 = vst [vmem:[%s3841_s6 + $0x28] sm:$0xff] %v244_v5   ;;  %v252_v7 = vld [vmem:[%s3836_s9 + $0xb0] sm:$0xff]   ;;  %v256_v8 = vld [vmem:[%s3836_s9 + $0xb8] sm:$0xff]  }
  0x24   : > { %249 = vst [vmem:[%s3841_s6 + $0x30] sm:$0xff] %v248_v6   ;;  %253 = vst [vmem:[%s3841_s6 + $0x38] sm:$0xff] %v252_v7   ;;  %v260_v9 = vld [vmem:[%s3836_s9 + $0xc0] sm:$0xff]   ;;  %v268_v11 = vld [vmem:[%s3836_s9 + $0x148] sm:$0xff]  }
  0x25   : > { %257 = vst [vmem:[%s3841_s6 + $0x40] sm:$0xff] %v256_v8   ;;  %v264_v10 = vld [vmem:[%s3836_s9 + $0x140] sm:$0xff]   ;;  %261 = vst [vmem:[%s3841_s6 + $0x48] sm:$0xff] %v260_v9   ;;  %v272_v12 = vld [vmem:[%s3836_s9 + $0x150] sm:$0xff]  }
  0x26   : > { %265 = vst [vmem:[%s3841_s6 + $0x50] sm:$0xff] %v264_v10   ;;  %269 = vst [vmem:[%s3841_s6 + $0x58] sm:$0xff] %v268_v11   ;;  %v276_v13 = vld [vmem:[%s3836_s9 + $0x158] sm:$0xff]   ;;  %v280_v14 = vld [vmem:[%s3836_s9 + $0x160] sm:$0xff]  }
  0x27   : > { %273 = vst [vmem:[%s3841_s6 + $0x60] sm:$0xff] %v272_v12   ;;  %277 = vst [vmem:[%s3841_s6 + $0x68] sm:$0xff] %v276_v13   ;;  %v284_v15 = vld [vmem:[%s3836_s9 + $0x1e0] sm:$0xff]   ;;  %v288_v16 = vld [vmem:[%s3836_s9 + $0x1e8] sm:$0xff]  }
  0x28   : > { %281 = vst [vmem:[%s3841_s6 + $0x70] sm:$0xff] %v280_v14   ;;  %v292_v17 = vld [vmem:[%s3836_s9 + $0x1f0] sm:$0xff]   ;;  %285 = vst [vmem:[%s3841_s6 + $0x78] sm:$0xff] %v284_v15   ;;  %v296_v18 = vld [vmem:[%s3836_s9 + $0x1f8] sm:$0xff]  }
  0x29   : > { %289 = vst [vmem:[%s3841_s6 + $0x80] sm:$0xff] %v288_v16   ;;  %293 = vst [vmem:[%s3841_s6 + $0x88] sm:$0xff] %v292_v17   ;;  %v300_v19 = vld [vmem:[%s3836_s9 + $0x200] sm:$0xff]  }
  0x2a   : > { %297 = vst [vmem:[%s3841_s6 + $0x90] sm:$0xff] %v296_v18   ;;  %301 = vst [vmem:[%s3841_s6 + $0x98] sm:$0xff] %v300_v19  }
  0x2b PF: > { %p2764_p12 = scmp.ge.s32.totalorder %s3708_s25, 1  ;;  %p405_p13 = scmp.lt.s32.totalorder %s3708_s25, 5 }
  0x2d   : > { %p406_p0 = pnand %p2764_p12, %p405_p13 }
  0x2e   : > { %s3883_s10 = sand.u32 (!%p406_p0), 1, %s3684_s19   ;;  %vm543_vm0 = vcmask (!%p406_p0), 31744   ;;  %vm646_vm1 = vsmask.f32 (!%p406_p0), 2304  ;;  %vm628_vm2 = vcmask (!%p406_p0), 1042432   ;;  %v3710_v22 = vmov (!%p406_p0), 0  }
  0x2f   : > { %409 = sbr.rel (%p406_p0) target bundleno = 909 (0x38d), region = 77  ;;  %549 = vst.msk [vmem:[#allocation2 + $0x28] sm:$0xff] (!%p406_p0), %vm543_vm0, %v3710_v22  ;;  %vm3900_vm3 = vmand (!%p406_p0), %vm628_vm2, %vm646_vm1  ;;  %v1273_v50 = vld [vmem:[#allocation3 + $0x24] sm:$0x7] (!%p406_p0)  ;;  %vm4795_vm4 = vcmask (!%p406_p0), 1046528   ;;  %vm691_vm5 = vcmask (!%p406_p0), 1041408  }
  0x30   : > { %s3421_s11 = smul.u32 (!%p406_p0), 160, %s3883_s10  ;;  %v1274_v15 = vsel (!%p406_p0), %vm3900_vm3, 0, %v1273_v50  ;;  %s3711_s15 = smov (!%p406_p0), 12   ;;  %vm4794_vm6 = vcmask (!%p406_p0), 1045504   ;;  %vm4796_vm7 = vsmask.f32 (!%p406_p0), 7424 }
  0x31   : > { %s3422_s13 = smul.u32 (!%p406_p0), 40, %s3883_s10  ;;  %1275 = vst [vmem:[#allocation3 + $0x24] sm:$0x7] (!%p406_p0), %v1274_v15  ;;  %s3712_s16 = smov (!%p406_p0), 8   ;;  %vm4793_vm8 = vsmask.f32 (!%p406_p0), 5376 }
  0x32   : > { %s3887_s14 = scalar_lea.vmem (!%p406_p0), [#allocation4], %s3421_s11  ;;  %s3713_s17 = smov (!%p406_p0), 20   ;;  %vm4792_vm9 = vcmask (!%p406_p0), 1044480   ;;  %vm795_vm10 = vcmask (!%p406_p0), 64512   ;;  %vm804_vm11 = vcmask (!%p406_p0), 97280   ;;  %vm813_vm12 = vcmask (!%p406_p0), 130048  }
  0x33   : > { %v440_v20 = vld [vmem:[%s3887_s14] sm:$0xf] (!%p406_p0)  ;;  %v441_v21 = vld [vmem:[%s3887_s14 + $0x4] sm:$0xf] (!%p406_p0)  ;;  %v442_v23 = vld [vmem:[%s3887_s14 + $0x8] sm:$0xf] (!%p406_p0) }
  0x34   : > { %v443_v24 = vld [vmem:[%s3887_s14 + $0xc] sm:$0xf] (!%p406_p0)  ;;  %v2765_v25 = vld [vmem:[%s3887_s14 + $0x28] sm:$0xf] (!%p406_p0)  ;;  %v2767_v27 = vld [vmem:[%s3887_s14 + $0x30] sm:$0xf] (!%p406_p0) }
  0x35   : > { %v2766_v26 = vld [vmem:[%s3887_s14 + $0x2c] sm:$0xf] (!%p406_p0)  ;;  %v2768_v28 = vld [vmem:[%s3887_s14 + $0x34] sm:$0xf] (!%p406_p0)  ;;  %v461_v30 = vmax.bf16 (!%p406_p0), %v2765_v25, %v440_v20  ;;  %v2775_v32 = vld [vmem:[%s3887_s14 + $0x50] sm:$0xf] (!%p406_p0)  ;;  %v463_v35 = vmax.bf16 (!%p406_p0), %v2767_v27, %v442_v23 }
  0x36   : > { %v462_v31 = vmax.bf16 %v2766_v26, %v441_v21  ;;  %v2776_v33 = vld [vmem:[%s3887_s14 + $0x54] sm:$0xf]  ;;  %v2777_v34 = vld [vmem:[%s3887_s14 + $0x58] sm:$0xf]  ;;  %v464_v36 = vmax.bf16 %v2768_v28, %v443_v24  ;;  %v2778_v37 = vld [vmem:[%s3887_s14 + $0x5c] sm:$0xf] }
  0x37   : > { %v2785_v38 = vld [vmem:[%s3887_s14 + $0x78] sm:$0xf]  ;;  %v2786_v39 = vld [vmem:[%s3887_s14 + $0x7c] sm:$0xf]  ;;  %v2787_v40 = vld [vmem:[%s3887_s14 + $0x80] sm:$0xf] }
  0x38   : > { %v2788_v41 = vld [vmem:[%s3887_s14 + $0x84] sm:$0xf]  ;;  %v493_v42 = vmax.bf16 %v2785_v38, %v2775_v32  ;;  %v494_v43 = vmax.bf16 %v2786_v39, %v2776_v33  ;;  %v444_v44 = vld [vmem:[%s3887_s14 + $0x10] sm:$0xf]  ;;  %v495_v45 = vmax.bf16 %v2787_v40, %v2777_v34  ;;  %v445_v47 = vld [vmem:[%s3887_s14 + $0x14] sm:$0xf] }
  0x39   : > { %v496_v46 = vmax.bf16 %v2788_v41, %v2778_v37  ;;  %v2769_v48 = vld [vmem:[%s3887_s14 + $0x38] sm:$0xf]  ;;  %v2770_v49 = vld [vmem:[%s3887_s14 + $0x3c] sm:$0xf]  ;;  %v2779_v55 = vld [vmem:[%s3887_s14 + $0x60] sm:$0xf] }
  0x3a   : > { %v503_v51 = vmax.bf16 %v493_v42, %v461_v30  ;;  %v504_v52 = vmax.bf16 %v494_v43, %v462_v31  ;;  %v465_v53 = vmax.bf16 %v2769_v48, %v444_v44  ;;  %v466_v54 = vmax.bf16 %v2770_v49, %v445_v47  ;;  %v2780_v56 = vld [vmem:[%s3887_s14 + $0x64] sm:$0xf]  ;;  %v2789_v57 = vld [vmem:[%s3887_s14 + $0x88] sm:$0xf]  ;;  %v2790_v60 = vld [vmem:[%s3887_s14 + $0x8c] sm:$0xf] }
  0x3b   : > { %v505_v58 = vmax.bf16 %v495_v45, %v463_v35  ;;  %v506_v59 = vmax.bf16 %v496_v46, %v464_v36  ;;  %v497_v61 = vmax.bf16 %v2789_v57, %v2779_v55  ;;  %v446_v62 = vld [vmem:[%s3887_s14 + $0x18] sm:$0xf]  ;;  %v447_v63 = vld [vmem:[%s3887_s14 + $0x1c] sm:$0xf]  ;;  %v498_v1 = vmax.bf16 %v2790_v60, %v2780_v56  ;;  %v2771_v2 = vld [vmem:[%s3887_s14 + $0x40] sm:$0xf] }
  0x3c   : > { %v2795_v0 = vcombine.low %v503_v51, %v504_v52  ;;  %v2772_v3 = vld [vmem:[%s3887_s14 + $0x44] sm:$0xf]  ;;  %v2781_v4 = vld [vmem:[%s3887_s14 + $0x68] sm:$0xf]  ;;  %v467_v7 = vmax.bf16 %v2771_v2, %v446_v62  ;;  %v2782_v9 = vld [vmem:[%s3887_s14 + $0x6c] sm:$0xf] }
  0x3d   : > { %v2796_v5 = vcombine.low %v505_v58, %v506_v59  ;;  %v507_v6 = vmax.bf16 %v497_v61, %v465_v53  ;;  %v468_v8 = vmax.bf16 %v2772_v3, %v447_v63  ;;  %v2791_v10 = vld [vmem:[%s3887_s14 + $0x90] sm:$0xf]  ;;  %v2792_v11 = vld [vmem:[%s3887_s14 + $0x94] sm:$0xf]  ;;  %v508_v12 = vmax.bf16 %v498_v1, %v466_v54  ;;  %v448_v16 = vld [vmem:[%s3887_s14 + $0x20] sm:$0xf] }
  0x3e   : > { %544 = vst.msk [vmem:[#allocation2] sm:$0xff] %vm543_vm0, %v2795_v0  ;;  %v499_v13 = vmax.bf16 %v2791_v10, %v2781_v4  ;;  %v500_v14 = vmax.bf16 %v2792_v11, %v2782_v9  ;;  %v449_v17 = vld [vmem:[%s3887_s14 + $0x24] sm:$0xf]  ;;  %v2773_v18 = vld [vmem:[%s3887_s14 + $0x48] sm:$0xf]  ;;  %s3714_s30 = smov 24  }
  0x3f   : > { %545 = vst.msk [vmem:[#allocation2 + $0x8] sm:$0xff] %vm543_vm0, %v2796_v5  ;;  %v2797_v19 = vcombine.low %v507_v6, %v508_v12  ;;  %v2774_v22 = vld [vmem:[%s3887_s14 + $0x4c] sm:$0xf]  ;;  %v469_v23 = vmax.bf16 %v2773_v18, %v448_v16  ;;  %v2783_v24 = vld [vmem:[%s3887_s14 + $0x70] sm:$0xf]  ;;  %s3715_s11 = smov 4  }
  0x40   : > { %v509_v20 = vmax.bf16 %v499_v13, %v467_v7  ;;  %v510_v21 = vmax.bf16 %v500_v14, %v468_v8  ;;  %v2784_v25 = vld [vmem:[%s3887_s14 + $0x74] sm:$0xf]  ;;  %v470_v26 = vmax.bf16 %v2774_v22, %v449_v17  ;;  %v2793_v27 = vld [vmem:[%s3887_s14 + $0x98] sm:$0xf]  ;;  %v2794_v28 = vld [vmem:[%s3887_s14 + $0x9c] sm:$0xf] }
  0x41   : > { %546 = vst.msk [vmem:[#allocation2 + $0x10] sm:$0xff] %vm543_vm0, %v2797_v19  ;;  %v501_v31 = vmax.bf16 %v2793_v27, %v2783_v24  ;;  %v502_v32 = vmax.bf16 %v2794_v28, %v2784_v25  ;;  %v3524_v11 = vld [vmem:[%s4787_s1] sm:$0xff]   ;;  %v3525_v24 = vld [vmem:[%s4787_s1 + $0x8] sm:$0xff]   ;;  %s3716_s27 = smov 16   ;;  %s3717_s9 = smov 28   ;;  %vm822_vm13 = vcmask 162816  }
  0x42   : > { %v2798_v30 = vcombine.low %v509_v20, %v510_v21  ;;  %3151 = vmatprep.subr.bf16.mxu0 %v3524_v11  ;;  %s3718_s6 = smov 32   ;;  %vm831_vm14 = vcmask 195584   ;;  %vm840_vm15 = vcmask 228352   ;;  %p2816_p1 = scmp.ne.s32.totalorder %s3692_s21, 0 }
  0x43   : > { %v511_v33 = vmax.bf16 %v501_v31, %v469_v23  ;;  %v512_v34 = vmax.bf16 %v502_v32, %v470_v26  ;;  %3152 = vmatpush3.bf16.msra.mxu0 %v3524_v11 }
  0x44   : > { %547 = vst.msk [vmem:[#allocation2 + $0x18] sm:$0xff] %vm543_vm0, %v2798_v30  ;;  %3153 = vmatprep.subr.bf16.mxu0 %v3525_v24 }
  0x45   : > { %v3942_v35 = vld [vmem:[#allocation2] sm:$0xe0]  ;;  %v2799_v42 = vcombine.low %v511_v33, %v512_v34 }
  0x46   : > { %v555_v36 = vld [vmem:[#allocation2] sm:$0xfe]  ;;  %v3944_v38 = vld [vmem:[#allocation2 + $0x8] sm:$0xff]  ;;  %v629_v39 = vrot.slane %v3942_v35, 5  ;;  %v648_v4 = vshrl.u32 %v3942_v35, 16  ;;  %v651_v10 = vshll.u32 %v3942_v35, 16 }
  0x47   : > { %v560_v37 = vld [vmem:[#allocation2] sm:$0xc0]  ;;  %v610_v40 = vrot.slane %v555_v36, 1  ;;  %v630_v43 = vrot.slane %v3944_v38, 5  ;;  %v611_v44 = vrot.slane %v3944_v38, 1  ;;  %v693_v45 = vrot.slane %v3944_v38, 6  ;;  %3154 = vmatpush3.bf16.msra.mxu0 %v3525_v24 }
  0x48   : > { %v692_v41 = vrot.slane %v560_v37, 6  ;;  %v3950_v46 = vld [vmem:[#allocation2 + $0x8] sm:$0xfc]  ;;  %v3952_v47 = vld [vmem:[#allocation2] sm:$0xff]  ;;  %548 = vst.msk [vmem:[#allocation2 + $0x20] sm:$0xff] %vm543_vm0, %v2799_v42  ;;  %v3958_v51 = vld [vmem:[#allocation2 + $0x10] sm:$0xff] }
  0x49   : > { %v569_v48 = vshll.u32 %v3952_v47, 16  ;;  %v631_v49 = vsel %vm628_vm2, %v629_v39, %v630_v43  ;;  %v612_v50 = vsel %vm4795_vm4, %v610_v40, %v611_v44  ;;  %v613_v52 = vrot.slane %v3958_v51, 1  ;;  %v3526_v39 = vld [vmem:[%s4787_s1 + $0x10] ss:$0 sps:$4 sm:$0x33]  }
  0x4a   : > { %638 = vrot.lane.b32.xlu0 %v631_v49, %s3711_s15  ;;  %617 = vrot.lane.b32.xlu1 %v612_v50, %s3712_s16  ;;  %v712_v53 = vrot.slane %v3950_v46, 2  ;;  %v567_v54 = vshrl.u32 %v3952_v47, 16  ;;  %v574_v55 = vshll.u32 %v3944_v38, 16  ;;  %v694_v56 = vsel %vm691_vm5, %v692_v41, %v693_v45 }
  0x4b   : > { %v713_v57 = vrot.slane %v3958_v51, 2  ;;  %v632_v58 = vrot.slane %v3958_v51, 5  ;;  %v571_v59 = vrot.slane %v569_v48, 1  ;;  %v614_v60 = vsel %vm4795_vm4, %v611_v44, %v613_v52  ;;  %v3974_v63 = vld [vmem:[#allocation2 + $0x18] sm:$0xff]  ;;  %3417 = vmatprep.subr.msk.bf16.mxu0 %vm691_vm5, %v3526_v39 }
  0x4c   : > { %v695_v61 = vrot.slane %v3958_v51, 6  ;;  %v578_v62 = vshrl.u32 %v3944_v38, 16  ;;  %v3977_v0 = vshll.u32 %v3958_v51, 16  ;;  %v3980_v1 = vshrl.u32 %v3958_v51, 16  ;;  %v554_v37 = vld [vmem:[#allocation2 + $0x18] sm:$0x7f] }
  0x4d   : > { %v572_v2 = vor.u32 %v571_v59, %v567_v54  ;;  %v576_v3 = vrot.slane %v574_v55, 1  ;;  %v714_v5 = vsel %vm4794_vm6, %v712_v53, %v713_v57  ;;  %v633_v6 = vsel %vm628_vm2, %v630_v43, %v632_v58 }
  0x4e   : > { %701 = vrot.lane.b32.xlu0 %v694_v56, %s3713_s17  ;;  %619 = vrot.lane.b32.xlu1 %v614_v60, %s3712_s16  ;;  %v696_v7 = vsel %vm691_vm5, %v693_v45, %v695_v61  ;;  %v715_v8 = vrot.slane %v3974_v63, 2  ;;  %v584_v12 = vrot.slane %v3977_v0, 1  ;;  %v655_v13 = vrot.slane %v578_v62, 5 }
  0x4f   : > { %v580_v9 = vor.u32 %v578_v62, %v576_v3  ;;  %v656_v14 = vrot.slane %v574_v55, 6  ;;  %v659_v15 = vrot.slane %v3980_v1, 5  ;;  %v577_v16 = vsel %vm4796_vm7, %v572_v2, %v576_v3 }
  0x50   : > { %v660_v17 = vrot.slane %v3977_v0, 6  ;;  %v650_v18 = vrot.slane %v648_v4, 5  ;;  %v664_v19 = vshrl.u32 %v3974_v63, 16  ;;  %v653_v20 = vrot.slane %v651_v10, 6  ;;  %v558_v4 = vld [vmem:[#allocation2 + $0x20] sm:$0x7] }
  0x51   : > { %v667_v21 = vshll.u32 %v3974_v63, 16  ;;  %v729_v22 = vshrl.u32 %v3950_v46, 16  ;;  %v732_v23 = vshll.u32 %v3950_v46, 16  ;;  %v716_v25 = vsel %vm4794_vm6, %v713_v57, %v715_v8  ;;  %v564_v46 = vld [vmem:[#allocation2 + $0x8] sm:$0xf8] }
  0x52   : > { %719 = vrot.lane.b32.xlu0 %v714_v5, %s3714_s30  ;;  %640 = vrot.lane.b32.xlu1 %v633_v6, %s3711_s15  ;;  %v585_v26 = vsel %vm4796_vm7, %v580_v9, %v584_v12  ;;  %v657_v27 = vor.u32 %v656_v14, %v655_v13  ;;  %v4016_v28 = vor.u32 %v660_v17, %v659_v15  ;;  %v736_v30 = vrot.slane %v3980_v1, 2 }
  0x53   : > { %v737_v31 = vrot.slane %v3977_v0, 3  ;;  %v740_v32 = vrot.slane %v664_v19, 2  ;;  %v654_v33 = vor.u32 %v653_v20, %v650_v18  ;;  %v741_v34 = vrot.slane %v667_v21, 3  ;;  %v559_v0 = vld [vmem:[#allocation2 + $0x20] sm:$0xf] }
  0x54   : > { %v731_v35 = vrot.slane %v729_v22, 2  ;;  %v734_v36 = vrot.slane %v732_v23, 3  ;;  %v662_v40 = vsel %vm646_vm1, %v657_v27, %v4016_v28  ;;  %v590_v45 = vshll.u32 %v554_v37, 16  ;;  %v562_v18 = vld [vmem:[#allocation2 + $0x20] sm:$0xff]  ;;  %v563_v23 = vld [vmem:[#allocation2 + $0x28] sm:$0x1] }
  0x55   : > { %v738_v41 = vor.u32 %v737_v31, %v736_v30  ;;  %v658_v42 = vsel %vm646_vm1, %v654_v33, %v657_v27  ;;  %v4032_v43 = vor.u32 %v741_v34, %v740_v32  ;;  %v588_v48 = vor.u32 %v3980_v1, %v584_v12 }
  0x56   : > { %703 = vrot.lane.b32.xlu1 %v696_v7, %s3713_s17  ;;  %597 = vrot.lane.b32.xlu0 %v577_v16, %s3715_s11  ;;  %v735_v44 = vor.u32 %v734_v36, %v731_v35  ;;  %v769_v49 = vrot.slane %v564_v46, 3  ;;  %v592_v54 = vrot.slane %v590_v45, 1  ;;  %v770_v55 = vrot.slane %v3958_v51, 3 }
  0x57   : > { %v743_v50 = vsel %vm4793_vm8, %v738_v41, %v4032_v43  ;;  %v896_v56 = vsel %vm691_vm5, %v3526_v39, 0  ;;  %v594_v57 = vshrl.u32 %v554_v37, 16  ;;  %v772_v62 = vrot.slane %v3974_v63, 3 }
  0x58   : > { %v739_v53 = vsel %vm4793_vm8, %v735_v44, %v738_v41  ;;  %v593_v59 = vsel %vm4796_vm7, %v588_v48, %v592_v54  ;;  %v771_v60 = vsel %vm4792_vm9, %v769_v49, %v770_v55  ;;  %3156 = vmatpush3.bf16.msra.mxu0 %v896_v56  ;;  %v615_v2 = vrot.slane %v554_v37, 1 }
  0x59   : > { %v596_v1 = vor.u32 %v594_v57, %v592_v54  ;;  %v773_v3 = vsel %vm4792_vm9, %v770_v55, %v772_v62  ;;  %v673_v5 = vshrl.u32 %v559_v0, 16  ;;  %v676_v6 = vshll.u32 %v559_v0, 16 }
  0x5a   : > { %721 = vrot.lane.b32.xlu1 %v716_v25, %s3714_s30  ;;  %599 = vrot.lane.b32.xlu0 %v585_v26, %s3715_s11  ;;  %v616_v7 = vsel %vm4795_vm4, %v613_v52, %v615_v2  ;;  %v634_v9 = vrot.slane %v3974_v63, 5  ;;  %v636_v10 = vrot.slane %v558_v4, 5  ;;  %v666_v11 = vrot.slane %v664_v19, 5 }
  0x5b   : > { %v669_v12 = vrot.slane %v667_v21, 6  ;;  %v675_v13 = vrot.slane %v673_v5, 5  ;;  %v678_v14 = vrot.slane %v676_v6, 6  ;;  %v697_v19 = vrot.slane %v3974_v63, 6 }
  0x5c   : > { %v637_v15 = vsel %vm628_vm2, %v634_v9, %v636_v10  ;;  %v635_v52 = vsel %vm628_vm2, %v632_v58, %v634_v9  ;;  %v699_v20 = vrot.slane %v559_v0, 6  ;;  %v745_v24 = vshrl.u32 %v562_v18, 16 }
  0x5d   : > { %v670_v16 = vor.u32 %v669_v12, %v666_v11  ;;  %v679_v17 = vor.u32 %v678_v14, %v675_v13  ;;  %v748_v25 = vshll.u32 %v562_v18, 16  ;;  %v717_v58 = vrot.slane %v562_v18, 2 }
  0x5e   : > { %683 = vrot.lane.b32.xlu1 %v662_v40, %s3716_s27  ;;  %681 = vrot.lane.b32.xlu0 %v658_v42, %s3716_s27  ;;  %v754_v26 = vshll.u32 %v563_v23, 16  ;;  %v700_v27 = vsel %vm691_vm5, %v697_v19, %v699_v20  ;;  %v698_v30 = vsel %vm691_vm5, %v695_v61, %v697_v19  ;;  %v747_v31 = vrot.slane %v745_v24, 2 }
  0x5f   : > { %v680_v21 = vsel %vm646_vm1, %v670_v16, %v679_v17  ;;  %v671_v22 = vsel %vm646_vm1, %v4016_v28, %v670_v16  ;;  %v750_v32 = vrot.slane %v748_v25, 3  ;;  %v718_v28 = vsel %vm4794_vm6, %v715_v8, %v717_v58 }
  0x60   : > { %v756_v34 = vrot.slane %v754_v26, 3  ;;  %v774_v36 = vrot.slane %v562_v18, 3  ;;  %v776_v37 = vrot.slane %v563_v23, 3  ;;  %vm849_vm1 = vcmask 261120  }
  0x61   : > { %v751_v33 = vor.u32 %v750_v32, %v747_v31  ;;  %vm885_vm2 = vcmask 293888  }
  0x62   : > { %760 = vrot.lane.b32.xlu1 %v743_v50, %s3717_s9  ;;  %758 = vrot.lane.b32.xlu0 %v739_v53, %s3717_s9  ;;  %v777_v63 = vsel %vm4792_vm9, %v774_v36, %v776_v37  ;;  %v775_v8 = vsel %vm4792_vm9, %v772_v62, %v774_v36 }
  0x63   : > { %v757_v35 = vsel %vm4793_vm8, %v751_v33, %v756_v34  ;;  %v752_v61 = vsel %vm4793_vm8, %v4032_v43, %v751_v33 }
  0x66   : > { %601 = vrot.lane.b32.xlu1 %v593_v59, %s3715_s11  ;;  %778 = vrot.lane.b32.xlu0 %v771_v60, %s3718_s6 }
  0x6a   : > { %603 = vrot.lane.b32.xlu1 %v596_v1, %s3715_s11  ;;  %780 = vrot.lane.b32.xlu0 %v773_v3, %s3718_s6 }
  0x6e   : > { %623 = vrot.lane.b32.xlu1 %v615_v2, %s3712_s16  ;;  %621 = vrot.lane.b32.xlu0 %v616_v7, %s3712_s16 }
  0x72   : > { %644 = vrot.lane.b32.xlu1 %v637_v15, %s3711_s15  ;;  %642 = vrot.lane.b32.xlu0 %v635_v52, %s3711_s15 }
  0x76   : > { %687 = vrot.lane.b32.xlu1 %v680_v21, %s3716_s27  ;;  %685 = vrot.lane.b32.xlu0 %v671_v22, %s3716_s27  ;;  %v553_v21 = vld [vmem:[#allocation2 + $0x18] sm:$0x3f] }
  0x7a   : > { %707 = vrot.lane.b32.xlu1 %v700_v27, %s3713_s17  ;;  %705 = vrot.lane.b32.xlu0 %v698_v30, %s3713_s17 }
  0x7e   : > { %725 = vrot.lane.b32.xlu1 %v717_v58, %s3714_s30  ;;  %723 = vrot.lane.b32.xlu0 %v718_v28, %s3714_s30  ;;  %s4289_s30 = scalar_lea.vmem [#allocation5], %s3422_s13 }
  0x82   : > { %764 = vrot.lane.b32.xlu1 %v757_v35, %s3717_s9  ;;  %762 = vrot.lane.b32.xlu0 %v752_v61, %s3717_s9 }
  0x86   : > { %784 = vrot.lane.b32.xlu1 %v777_v63, %s3718_s6  ;;  %782 = vrot.lane.b32.xlu0 %v775_v8, %s3718_s6 }
  0xbc   : > { %v639_v39 = vpop.permute.xlu0 %638  ;;  %v618_v40 = vpop.permute.xlu1 %617 }
  0xc0   : > { %v702_v41 = vpop.permute.xlu0 %701  ;;  %v620_v42 = vpop.permute.xlu1 %619 }
  0xc4   : > { %v720_v44 = vpop.permute.xlu0 %719  ;;  %v641_v43 = vpop.permute.xlu1 %640 }
  0xc8   : > { %v704_v45 = vpop.permute.xlu1 %703  ;;  %v598_v46 = vpop.permute.xlu0 %597 }
  0xc9   : > { %v787_v48 = vsel %vm543_vm0, %v3952_v47, %v598_v46 }
  0xca   : > { %v797_v53 = vsel %vm795_vm10, %v787_v48, %v618_v40 }
  0xcb   : > { %v806_v59 = vsel %vm804_vm11, %v797_v53, %v639_v39 }
  0xcc   : > { %v722_v49 = vpop.permute.xlu1 %721  ;;  %v600_v50 = vpop.permute.xlu0 %599 }
  0xcd   : > { %v789_v54 = vsel %vm543_vm0, %v3944_v38, %v600_v50 }
  0xce   : > { %v799_v55 = vsel %vm795_vm10, %v789_v54, %v620_v42 }
  0xcf   : > { %v808_v57 = vsel %vm804_vm11, %v799_v55, %v641_v43 }
  0xd0   : > { %v684_v56 = vpop.permute.xlu1 %683  ;;  %v682_v60 = vpop.permute.xlu0 %681 }
  0xd1   : > { %v815_v47 = vsel %vm813_vm12, %v806_v59, %v682_v60  ;;  %v817_v0 = vsel %vm813_vm12, %v808_v57, %v684_v56 }
  0xd2   : > { %v824_v62 = vsel %vm822_vm13, %v815_v47, %v702_v41  ;;  %v826_v3 = vsel %vm822_vm13, %v817_v0, %v704_v45  ;;  %v1143_v41 = vld [vmem:[#allocation3] sm:$0x1] }
  0xd3   : > { %v833_v2 = vsel %vm831_vm14, %v824_v62, %v720_v44  ;;  %v835_v7 = vsel %vm831_vm14, %v826_v3, %v722_v49  ;;  %v971_v44 = vlaneseq }
  0xd4   : > { %v761_v1 = vpop.permute.xlu1 %760  ;;  %v759_v38 = vpop.permute.xlu0 %758 }
  0xd5   : > { %v842_v4 = vsel %vm840_vm15, %v833_v2, %v759_v38  ;;  %v844_v10 = vsel %vm840_vm15, %v835_v7, %v761_v1  ;;  %v972_v43 = vshrl.u32 %v971_v44, 7 }
  0xd7   : > { %v974_v45 = vadd.s32 16, %v972_v43  ;;  %v975_v46 = vadd.s32 24, %v972_v43  ;;  %v973_v48 = vadd.s32 8, %v972_v43 }
  0xd8   : > { %v602_v5 = vpop.permute.xlu1 %601  ;;  %v779_v6 = vpop.permute.xlu0 %778  ;;  %v4138_v53 = vmul.u32.u64.low 3435973837, %v972_v43  ;;  %v4139_v54 = vmul.u32.u64.high 3435973837, %v972_v43, %v4138_v53 }
  0xd9   : > { %v851_v9 = vsel %vm849_vm1, %v842_v4, %v779_v6  ;;  %v791_v24 = vsel %vm543_vm0, %v3958_v51, %v602_v5  ;;  %v4135_v49 = vmul.u32.u64.low 3435973837, %v974_v45  ;;  %v4136_v50 = vmul.u32.u64.high 3435973837, %v974_v45, %v4135_v49 }
  0xda   : > { %3157 = vmatprep.mubr.msk.bf16.mxu0 %vm885_vm2, %v851_v9  ;;  %v4141_v55 = vmul.u32.u64.low 3435973837, %v975_v46  ;;  %v4142_v56 = vmul.u32.u64.high 3435973837, %v975_v46, %v4141_v55  ;;  %v4144_v57 = vmul.u32.u64.low 3435973837, %v973_v48  ;;  %v4145_v59 = vmul.u32.u64.high 3435973837, %v973_v48, %v4144_v57 }
  0xdb   : > { %v1008_v60 = vshrl.u32 %v4136_v50, 3  ;;  %v986_v47 = vshrl.u32 %v4139_v54, 3 }
  0xdc   : > { %v604_v11 = vpop.permute.xlu1 %603  ;;  %v781_v12 = vpop.permute.xlu0 %780  ;;  %v1019_v62 = vshrl.u32 %v4142_v56, 3  ;;  %v997_v0 = vshrl.u32 %v4145_v59, 3 }
  0xdd   : > { %v853_v13 = vsel %vm849_vm1, %v844_v10, %v781_v12  ;;  %v794_v25 = vsel %vm543_vm0, %v553_v21, %v604_v11  ;;  %vm1140_vm0 = vcmask 1040384   ;;  %v1009_v1 = vmul.u32 10, %v1008_v60 }
  0xde   : > { %3158 = vmatmul.mubr.msk.bf16.vlgmr.msra.gmra.mrb[0].mxu0 %vm885_vm2, %v853_v13  ;;  %v987_v38 = vmul.u32 10, %v986_v47  ;;  %v1020_v2 = vmul.u32 10, %v1019_v62  ;;  %v4159_v13 = vadd.s32 48, %v972_v43 }
  0xdf   : > { %v998_v3 = vmul.u32 10, %v997_v0  ;;  %v1010_v4 = vsub.s32 %v974_v45, %v1009_v1 }
  0xe0   : > { %v624_v14 = vpop.permute.xlu1 %623  ;;  %v622_v15 = vpop.permute.xlu0 %621  ;;  %v988_v5 = vsub.s32 %v972_v43, %v987_v38  ;;  %v1021_v6 = vsub.s32 %v975_v46, %v1020_v2 }
  0xe1   : > { %v803_v58 = vsel %vm795_vm10, %v794_v25, %v624_v14  ;;  %v801_v26 = vsel %vm795_vm10, %v791_v24, %v622_v15  ;;  %vm1141_vm10 = vsmask.f32 256  ;;  %v999_v7 = vsub.s32 %v973_v48, %v998_v3 }
  0xe2   : > { %v1094_v10 = vadd.s32 10, %v1010_v4  ;;  %v1092_v12 = vadd.s32 10, %v988_v5  ;;  %v1095_v15 = vadd.s32 10, %v1021_v6 }
  0xe3   : > { %vm1077_vm9 = vcmp.lt.s32.totalorder %v999_v7, 0 }
  0xe4   : > { %v645_v52 = vpop.permute.xlu1 %644  ;;  %v643_v16 = vpop.permute.xlu0 %642 }
  0xe5   : > { %v812_v27 = vsel %vm804_vm11, %v803_v58, %v645_v52  ;;  %v810_v30 = vsel %vm804_vm11, %v801_v26, %v643_v16  ;;  %vm1142_vm11 = vmand %vm1140_vm0, %vm1141_vm10  ;;  %v1093_v52 = vadd.s32 10, %v999_v7  ;;  %v4188_v58 = vadd.s32 56, %v972_v43 }
  0xe6   : > { %v1144_v42 = vsel %vm1142_vm11, 0, %v1143_v41  ;;  %vm1069_vm11 = vcmp.ne.s32.totalorder %v999_v7, 0 }
  0xe7   : > { %1145 = vst [vmem:[#allocation3] sm:$0x1] %v1144_v42 }
  0xe8   : > { %v688_v17 = vpop.permute.xlu1 %687  ;;  %v686_v18 = vpop.permute.xlu0 %685 }
  0xe9   : > { %v821_v28 = vsel %vm813_vm12, %v812_v27, %v688_v17  ;;  %v819_v33 = vsel %vm813_vm12, %v810_v30, %v686_v18  ;;  %vm1070_vm12 = vcmp.ne.s32.totalorder %v1010_v4, 0  ;;  %v4172_v17 = vld [vmem:[%s4788_s2] ss:$0 sm:$0xff] }
  0xec   : > { %v708_v19 = vpop.permute.xlu1 %707  ;;  %v706_v20 = vpop.permute.xlu0 %705 }
  0xed   : > { %v830_v34 = vsel %vm822_vm13, %v821_v28, %v708_v19  ;;  %v828_v51 = vsel %vm822_vm13, %v819_v33, %v706_v20  ;;  %vm1078_vm13 = vcmp.lt.s32.totalorder %v1010_v4, 0  ;;  %v4176_v19 = vadd.s32 32, %v972_v43 }
  0xee   : > { %vm4151_vm0 = vmand %vm1078_vm13, %vm1070_vm12 }
  0xef   : > { %vm4165_vm12 = vmand %vm1077_vm9, %vm1069_vm11  ;;  %v1102_v18 = vsel %vm4151_vm0, %v1094_v10, %v1010_v4 }
  0xf0   : > { %v726_v22 = vpop.permute.xlu1 %725  ;;  %v724_v23 = vpop.permute.xlu0 %723  ;;  %v1101_v25 = vsel %vm4165_vm12, %v1093_v52, %v999_v7  ;;  %vm4191_vm9 = vcmp.lt.s32.totalorder %v1102_v18, 8 }
  0xf1   : > { %v839_v35 = vsel %vm831_vm14, %v830_v34, %v726_v22  ;;  %v837_v61 = vsel %vm831_vm14, %v828_v51, %v724_v23  ;;  %vm1068_vm14 = vcmp.ne.s32.totalorder %v988_v5, 0  ;;  %vm4207_vm13 = vcmp.lt.s32.totalorder %v1101_v25, 8 }
  0xf2   : > { %v4181_v21 = vmul.u32.u64.low 3435973837, %v4159_v13  ;;  %v4182_v22 = vmul.u32.u64.high 3435973837, %v4159_v13, %v4181_v21  ;;  %v4203_v34 = vmul.u32.u64.low 3435973837, %v4176_v19  ;;  %v4204_v51 = vmul.u32.u64.high 3435973837, %v4176_v19, %v4203_v34 }
  0xf4   : > { %v765_v31 = vpop.permute.xlu1 %764  ;;  %v763_v32 = vpop.permute.xlu0 %762  ;;  %v1052_v53 = vshrl.u32 %v4182_v22, 3  ;;  %v1030_v62 = vshrl.u32 %v4204_v51, 3 }
  0xf5   : > { %v848_v36 = vsel %vm840_vm15, %v839_v35, %v765_v31  ;;  %v846_v37 = vsel %vm840_vm15, %v837_v61, %v763_v32  ;;  %vm1076_vm15 = vcmp.lt.s32.totalorder %v988_v5, 0  ;;  %v4195_v31 = vadd.s32 40, %v972_v43 }
  0xf6   : > { %vm4155_vm8 = vmand %vm1076_vm15, %vm1068_vm14  ;;  %vm1250_vm14 = vcmask 1043456   ;;  %vm1251_vm15 = vsmask.f32 7938  ;;  %v1053_v2 = vmul.u32 10, %v1052_v53 }
  0xf7   : > { %v1100_v20 = vsel %vm4155_vm8, %v1092_v12, %v988_v5  ;;  %v4219_v44 = vmul.u32.u64.low 3435973837, %v4195_v31  ;;  %v4220_v43 = vmul.u32.u64.high 3435973837, %v4195_v31, %v4219_v44  ;;  %v1253_v5 = vld [vmem:[#allocation3] sm:$0xf] }
  0xf8   : > { %v785_v63 = vpop.permute.xlu1 %784  ;;  %v783_v8 = vpop.permute.xlu0 %782  ;;  %vm4198_vm8 = vcmp.lt.s32.totalorder %v1100_v20, 8  ;;  %v1031_v20 = vmul.u32 10, %v1030_v62  ;;  %v1054_v28 = vsub.s32 %v4159_v13, %v1053_v2 }
  0xf9   : > { %v857_v39 = vsel %vm849_vm1, %v848_v36, %v785_v63  ;;  %v855_v40 = vsel %vm849_vm1, %v846_v37, %v783_v8  ;;  %vm1071_vm1 = vcmp.ne.s32.totalorder %v1021_v6, 0 }
  0xfa   : > { %3161 = vmatprep.mubr.msk.bf16.mxu0 %vm885_vm2, %v855_v40  ;;  %vm1082_vm11 = vcmp.lt.s32.totalorder %v1054_v28, 0 }
  0xfb   : > { %3162 = vmatmul.mubr.msk.bf16.gmra.mrb[4].mxu0 %vm885_vm2, %v857_v39  ;;  %vm1079_vm2 = vcmp.lt.s32.totalorder %v1021_v6, 0  ;;  %v4213_v39 = vmul.u32.u64.low 3435973837, %v4188_v58  ;;  %v4214_v40 = vmul.u32.u64.high 3435973837, %v4188_v58, %v4213_v39 }
  0xfc   : > { %vm4161_vm6 = vmand %vm1079_vm2, %vm1071_vm1  ;;  %vm1170_vm1 = vsmask.f32 4368 }
  0xfd   : > { %v1103_v24 = vsel %vm4161_vm6, %v1095_v15, %v1021_v6  ;;  %vm4228_vm2 = vmand %vm1250_vm14, %vm1251_vm15  ;;  %v1063_v9 = vshrl.u32 %v4214_v40, 3  ;;  %v1041_v15 = vshrl.u32 %v4220_v43, 3 }
  0xfe   : > { %vm1111_vm6 = vcmp.lt.s32.totalorder %v1103_v24, 8  ;;  %vm4236_vm0 = vmor %vm1141_vm10, %vm1170_vm1  ;;  %vm1074_vm10 = vcmp.ne.s32.totalorder %v1054_v28, 0 }
 0x1b1   : > { %v3159_v23 = vpop.f32.mrb[0].mxu0 }
 0x1b2   : > { %v941_v26 = vadd.f32 %v3159_v23, %v4172_v17  ;;  %v932_v30 = vpop.f32.mrb[1].mxu0 }
 0x1b3   : > { %v933_v32 = vadd.f32 %v4172_v17, %v932_v30  ;;  %v3160_v33 = vpop.f32.mrb[2].mxu0 }
 0x1b4   : > { %v965_v35 = vmax.f32 %v941_v26, 0.0  ;;  %v944_v61 = vadd.f32 %v3160_v33, %v4172_v17  ;;  %v935_v36 = vpop.f32.mrb[3].mxu0  ;;  %v1064_v26 = vmul.u32 10, %v1063_v9  ;;  %v1032_v33 = vsub.s32 %v4176_v19, %v1031_v20 }
 0x1b5   : > { %v963_v63 = vmax.f32 %v933_v32, 0.0  ;;  %v936_v8 = vadd.f32 %v4172_v17, %v935_v36  ;;  %v1042_v32 = vmul.u32 10, %v1041_v15 }
 0x1b6   : > { %v1134_v41 = vsel %vm4191_vm9, %v965_v35, 0.0  ;;  %v966_v42 = vmax.f32 %v944_v61, 0.0  ;;  %v1065_v34 = vsub.s32 %v4188_v58, %v1064_v26  ;;  %vm1072_vm12 = vcmp.ne.s32.totalorder %v1032_v33, 0 }
 0x1b7   : > { %v3039_v45 = vpack.c.bf16 %v1134_v41, %v1134_v41  ;;  %v1132_v46 = vsel %vm4198_vm8, %v963_v63, 0.0  ;;  %v964_v48 = vmax.f32 %v936_v8, 0.0  ;;  %v1043_v51 = vsub.s32 %v4195_v31, %v1042_v32 }
 0x1b8   : > { %v3037_v49 = vpack.c.bf16 %v1132_v46, %v1132_v46  ;;  %v1135_v50 = vsel %vm1111_vm6, %v966_v42, 0.0  ;;  %vm1080_vm9 = vcmp.lt.s32.totalorder %v1032_v33, 0  ;;  %v1098_v35 = vadd.s32 10, %v1054_v28 }
 0x1b9   : > { %v1190_v54 = vshrl.u32 %v3039_v45, 16  ;;  %v3040_v55 = vpack.c.bf16 %v1135_v50, %v1135_v50  ;;  %v1133_v56 = vsel %vm4207_vm13, %v964_v48, 0.0  ;;  %v1193_v3 = vshll.u32 %v3039_v45, 16  ;;  %vm1090_vm13 = vmand %vm1082_vm11, %vm1074_vm10 }
 0x1ba   : > { %v1173_v57 = vshrl.u32 %v3037_v49, 16  ;;  %v3038_v59 = vpack.c.bf16 %v1133_v56, %v1133_v56  ;;  %v1176_v1 = vshll.u32 %v3037_v49, 16  ;;  %vm1075_vm8 = vcmp.ne.s32.totalorder %v1065_v34, 0  ;;  %vm4254_vm1 = vmand %vm1080_vm9, %vm1072_vm12 }
 0x1bb   : > { %v1192_v60 = vrot.slane %v1190_v54, 7  ;;  %v1199_v47 = vshrl.u32 %v3040_v55, 16  ;;  %v1202_v7 = vshll.u32 %v3040_v55, 16  ;;  %vm1083_vm6 = vcmp.lt.s32.totalorder %v1065_v34, 0 }
 0x1bc   : > { %v1175_v0 = vrot.slane %v1173_v57, 7  ;;  %v1181_v38 = vshrl.u32 %v3038_v59, 16  ;;  %v1184_v14 = vshll.u32 %v3038_v59, 16  ;;  %v1096_v61 = vadd.s32 10, %v1032_v33  ;;  %vm4258_vm4 = vmand %vm1083_vm6, %vm1075_vm8 }
 0x1bd   : > { %v4232_v6 = vrot.slane %v1199_v47, 7  ;;  %v1195_v52 = vor.u32 %v1193_v3, %v1192_v60  ;;  %v1197_v16 = vrot.slane %v1192_v60, 4  ;;  %vm1073_vm14 = vcmp.ne.s32.totalorder %v1043_v51, 0 }
 0x1be   : > { %v1178_v11 = vor.u32 %v1176_v1, %v1175_v0  ;;  %v1183_v12 = vrot.slane %v1181_v38, 7  ;;  %v1179_v21 = vrot.slane %v1175_v0, 4  ;;  %vm1081_vm15 = vcmp.lt.s32.totalorder %v1043_v51, 0 }
 0x1bf   : > { %v1204_v18 = vor.u32 %v1202_v7, %v4232_v6  ;;  %v1099_v13 = vadd.s32 10, %v1065_v34  ;;  %v1097_v58 = vadd.s32 10, %v1043_v51  ;;  %v1106_v31 = vsel %vm1090_vm13, %v1098_v35, %v1054_v28  ;;  %vm4262_vm7 = vmand %vm1081_vm15, %vm1073_vm14 }
 0x1c0   : > { %v1254_v22 = vsel %vm4228_vm2, %v1178_v11, %v1253_v5  ;;  %v1186_v23 = vor.u32 %v1184_v14, %v1183_v12  ;;  %v1188_v24 = vrot.slane %v1183_v12, 4  ;;  %v1104_v8 = vsel %vm4254_vm1, %v1096_v61, %v1032_v33 }
 0x1c1   : > { %1255 = vst [vmem:[#allocation3] sm:$0xf] %v1254_v22  ;;  %v1205_v25 = vsel %vm4236_vm0, %v1197_v16, %v1204_v18  ;;  %v1107_v41 = vsel %vm4258_vm4, %v1099_v13, %v1065_v34  ;;  %vm1114_vm10 = vcmp.lt.s32.totalorder %v1106_v31, 8  ;;  %v1105_v43 = vsel %vm4262_vm7, %v1097_v58, %v1043_v51  ;;  %v1263_v22 = vld [vmem:[#allocation3 + $0x1c] sm:$0x7] }
 0x1c2   : > { %1258 = vst [vmem:[#allocation3 + $0xc] sm:$0xf] %v1205_v25  ;;  %v1187_v27 = vsel %vm4236_vm0, %v1179_v21, %v1186_v23  ;;  %v1196_v30 = vsel %vm4236_vm0, %v1188_v24, %v1195_v52  ;;  %vm1112_vm11 = vcmp.lt.s32.totalorder %v1104_v8, 8  ;;  %vm1115_vm12 = vcmp.lt.s32.totalorder %v1107_v41, 8 }
 0x1c3   : > { %1256 = vst [vmem:[#allocation3 + $0x4] sm:$0xf] %v1187_v27  ;;  %1257 = vst [vmem:[#allocation3 + $0x8] sm:$0xf] %v1196_v30  ;;  %vm1113_vm9 = vcmp.lt.s32.totalorder %v1105_v43, 8  ;;  %v1206_v14 = vrot.slane %v4232_v6, 4 }
 0x1c4   : > { %vm1266_vm4 = vcmask 1043458   ;;  %vm1267_vm7 = vsmask.f32 7946  ;;  %vm1283_vm6 = vsmask.f32 (!%p2816_p1), 1280 }
 0x1c5   : > { %vm1268_vm8 = vmand %vm1266_vm4, %vm1267_vm7 }
 0x1c8   : > { %v1280_v34 = vld [vmem:[#allocation3] sm:$0xf] (!%p2816_p1) }
 0x1c9   : > { %v1281_v10 = vsel (!%p2816_p1), %vm4228_vm2, 0, %v1280_v34 }
 0x1ca   : > { %v1285_v51 = vld [vmem:[#allocation3 + $0x4] sm:$0x3] (!%p2816_p1)  ;;  %1282 = vst [vmem:[#allocation3] sm:$0xf] (!%p2816_p1), %v1281_v10 }
 0x1ce   : > { %v3163_v63 = vpop.f32.mrb[4].mxu0 }
 0x1cf   : > { %v957_v39 = vadd.f32 %v3163_v63, %v4172_v17  ;;  %v948_v40 = vpop.f32.mrb[5].mxu0 }
 0x1d0   : > { %v949_v42 = vadd.f32 %v4172_v17, %v948_v40  ;;  %v3164_v44 = vpop.f32.mrb[6].mxu0 }
 0x1d1   : > { %v969_v45 = vmax.f32 %v957_v39, 0.0  ;;  %v960_v46 = vadd.f32 %v3164_v44, %v4172_v17  ;;  %v951_v48 = vpop.f32.mrb[7].mxu0 }
 0x1d2   : > { %v967_v49 = vmax.f32 %v949_v42, 0.0  ;;  %v952_v50 = vadd.f32 %v4172_v17, %v951_v48 }
 0x1d3   : > { %v1138_v53 = vsel %vm1114_vm10, %v969_v45, 0.0  ;;  %v970_v54 = vmax.f32 %v960_v46, 0.0 }
 0x1d4   : > { %v3043_v55 = vpack.c.bf16 %v1138_v53, %v1138_v53  ;;  %v1136_v56 = vsel %vm1112_vm11, %v967_v49, 0.0  ;;  %v968_v57 = vmax.f32 %v952_v50, 0.0 }
 0x1d5   : > { %v3041_v59 = vpack.c.bf16 %v1136_v56, %v1136_v56  ;;  %v1139_v60 = vsel %vm1115_vm12, %v970_v54, 0.0 }
 0x1d6   : > { %v1226_v47 = vshrl.u32 %v3043_v55, 16  ;;  %v3044_v62 = vpack.c.bf16 %v1139_v60, %v1139_v60  ;;  %v1137_v0 = vsel %vm1113_vm9, %v968_v57, 0.0  ;;  %v1229_v11 = vshll.u32 %v3043_v55, 16 }
 0x1d7   : > { %v1208_v1 = vshrl.u32 %v3041_v59, 16  ;;  %v3042_v38 = vpack.c.bf16 %v1137_v0, %v1137_v0  ;;  %v1211_v7 = vshll.u32 %v3041_v59, 16 }
 0x1d8   : > { %v1228_v2 = vrot.slane %v1226_v47, 7  ;;  %v1235_v3 = vshrl.u32 %v3044_v62, 16  ;;  %v1238_v12 = vshll.u32 %v3044_v62, 16 }
 0x1d9   : > { %v1210_v5 = vrot.slane %v1208_v1, 7  ;;  %v1217_v9 = vshrl.u32 %v3042_v38, 16  ;;  %v1220_v16 = vshll.u32 %v3042_v38, 16 }
 0x1da   : > { %v1237_v17 = vrot.slane %v1235_v3, 7  ;;  %v1231_v18 = vor.u32 %v1229_v11, %v1228_v2  ;;  %v1233_v20 = vrot.slane %v1228_v2, 4 }
 0x1db   : > { %v1213_v15 = vor.u32 %v1211_v7, %v1210_v5  ;;  %v1219_v52 = vrot.slane %v1217_v9, 7  ;;  %v1215_v24 = vrot.slane %v1210_v5, 4 }
 0x1dc   : > { %v1240_v21 = vor.u32 %v1238_v12, %v1237_v17 }
 0x1dd   : > { %v1214_v23 = vsel %vm4236_vm0, %v1206_v14, %v1213_v15  ;;  %v1222_v25 = vor.u32 %v1220_v16, %v1219_v52  ;;  %v1224_v26 = vrot.slane %v1219_v52, 4 }
 0x1de   : > { %1259 = vst [vmem:[#allocation3 + $0x10] sm:$0xf] %v1214_v23  ;;  %v1241_v27 = vsel %vm4236_vm0, %v1233_v20, %v1240_v21 }
 0x1df   : > { %v1264_v6 = vsel %vm3900_vm3, %v1241_v27, %v1263_v22  ;;  %v1223_v30 = vsel %vm4236_vm0, %v1215_v24, %v1222_v25  ;;  %v1232_v32 = vsel %vm4236_vm0, %v1224_v26, %v1231_v18  ;;  %vm1284_vm0 = vmand (!%p2816_p1), %vm691_vm5, %vm1283_vm6 }
 0x1e0   : > { %1265 = vst [vmem:[#allocation3 + $0x1c] sm:$0x7] %v1264_v6  ;;  %1260 = vst [vmem:[#allocation3 + $0x14] sm:$0xf] %v1223_v30  ;;  %v1286_v35 = vsel (!%p2816_p1), %vm1284_vm0, 0, %v1285_v51 }
 0x1e1   : > { %1261 = vst [vmem:[#allocation3 + $0x18] sm:$0xf] %v1232_v32  ;;  %1287 = vst [vmem:[#allocation3 + $0x4] sm:$0x3] (!%p2816_p1), %v1286_v35 }
 0x1e3   : > { %1279 = sbr.rel (%p2816_p1) target bundleno = 490 (0x1ea), region = 85 }
 0x1e7   : > { %v1269_v28 = vld [vmem:[#allocation3 + $0x1c] sm:$0xc] }
 0x1e8   : > { %v1270_v33 = vsel %vm1268_vm8, 0, %v1269_v28 }
 0x1e9   : > { %1271 = vst [vmem:[#allocation3 + $0x1c] sm:$0xc] %v1270_v33 }
 0x1ea PF: > { %p2817_p2 = scmp.ne.s32.totalorder %s3692_s21, 1 }
 0x1eb   : > { %vm1292_vm13 = vcmask (!%p2817_p2), 1043457   ;;  %vm1293_vm14 = vsmask.f32 (!%p2817_p2), 7942  ;;  %v1295_v61 = vld [vmem:[#allocation3 + $0x18] sm:$0xe] (!%p2817_p2) }
 0x1ec   : > { %1291 = sbr.rel (%p2817_p2) target bundleno = 499 (0x1f3), region = 89  ;;  %vm1294_vm15 = vmand (!%p2817_p2), %vm1292_vm13, %vm1293_vm14 }
 0x1ed   : > { %v1296_v13 = vsel (!%p2817_p2), %vm1294_vm15, 0, %v1295_v61 }
 0x1ee   : > { %1297 = vst [vmem:[#allocation3 + $0x18] sm:$0xe] (!%p2817_p2), %v1296_v13 }
 0x1f0   : > { %v1298_v36 = vld [vmem:[#allocation3 + $0x1c] sm:$0x7] (!%p2817_p2) }
 0x1f1   : > { %v1299_v19 = vsel (!%p2817_p2), %vm3900_vm3, 0, %v1298_v36 }
 0x1f2   : > { %1300 = vst [vmem:[#allocation3 + $0x1c] sm:$0x7] (!%p2817_p2), %v1299_v19 }
 0x1f3 PF: > { %v3527_v4 = vld [vmem:[%s4789_s3 + $0x40] sm:$0xff]   ;;  %v3719_v58 = vmov 0.0   ;;  %v3529_v29 = vld [vmem:[%s4789_s3 + $0x48] sm:$0xff]   ;;  %vm3720_vm3 = vmmov 0   ;;  %v3531_v63 = vld [vmem:[%s4789_s3 + $0x50] sm:$0xff]   ;;  %vm4828_vm1 = vcmask 1046528  }
 0x1f4   : > { %3165 = vmatprep.subr.bf16.mxu1 %v3719_v58  ;;  %3193 = vmatprep.subr.bf16.mxu0 %v3719_v58  ;;  %v3528_v31 = vld [vmem:[%s4789_s3] sm:$0xff]   ;;  %v3530_v37 = vld [vmem:[%s4789_s3 + $0x8] sm:$0xff]   ;;  %v3532_v8 = vld [vmem:[%s4789_s3 + $0x10] sm:$0xff]   ;;  %vm4826_vm5 = vsmask.f32 7424  ;;  %vm4832_vm4 = vcmask 1045504  }
 0x1f5   : > { %3166 = vmatpush3.bf16.msra.mxu1 %v3527_v4  ;;  %3181 = vmatprep.mubr.msk.bf16.mxu1 %vm3720_vm3, %v3719_v58  ;;  %v3533_v39 = vld [vmem:[%s4789_s3 + $0x58] sm:$0xff]   ;;  %v3535_v41 = vld [vmem:[%s4789_s3 + $0x60] sm:$0xff]   ;;  %v1301_v44 = vld [vmem:[#allocation3] sm:$0xf]  ;;  %vm1907_vm9 = vsmask.f32 6400 }
 0x1f6   : > { %3194 = vmatpush3.bf16.msra.mxu0 %v3528_v31  ;;  %3167 = vmatprep.subr.bf16.mxu1 %v3719_v58  ;;  %v3534_v40 = vld [vmem:[%s4789_s3 + $0x18] sm:$0xff]   ;;  %v3536_v42 = vld [vmem:[%s4789_s3 + $0x20] sm:$0xff]   ;;  %v4342_v43 = vld [vmem:[#allocation3 + $0x4] sm:$0xf]  ;;  %vm4835_vm6 = vsmask.f32 5376 }
 0x1f7   : > { %3195 = vmatprep.subr.bf16.mxu0 %v3719_v58  ;;  %3209 = vmatprep.mubr.msk.bf16.mxu0 %vm3720_vm3, %v3719_v58  ;;  %v3537_v45 = vld [vmem:[%s4789_s3 + $0x68] sm:$0xff]   ;;  %v2834_v46 = vcombine.low %v1301_v44, %v4342_v43  ;;  %v4348_v48 = vld [vmem:[#allocation3 + $0x8] sm:$0xff]   ;;  %v3539_v53 = vld [vmem:[%s4789_s3 + $0x70] sm:$0xff]   ;;  %vm4838_vm14 = vcmask 1044480   ;;  %s3439_s14 = smul.u32 5, %s3692_s21  ;;  %s2674_s21 = sshll.u32 %s4289_s30, 4  ;;  %s4730_s21 = int_to_ptr.vmem [resolvable:$true] %s2674_s21 }
 0x1f8   : > { %v3538_v49 = vld [vmem:[%s4789_s3 + $0x28] sm:$0xff]   ;;  %v1363_v56 = vshll.u32 %v4348_v48, 16  ;;  %v3540_v57 = vld [vmem:[%s4789_s3 + $0x30] sm:$0xff]   ;;  %v4364_v59 = vld [vmem:[#allocation3 + $0x10] sm:$0xf]  ;;  %v1367_v5 = vshrl.u32 %v4348_v48, 16 }
 0x1f9   : > { %3168 = vmatpush3.bf16.msra.mxu1 %v3529_v29  ;;  %v1358_v50 = vshll.u32 %v2834_v46, 16  ;;  %v1356_v54 = vshrl.u32 %v2834_v46, 16  ;;  %v1322_v60 = vld [vmem:[#allocation3 + $0x14] sm:$0x1]  ;;  %v3541_v47 = vld [vmem:[%s4789_s3 + $0x78] sm:$0xff]   ;;  %v3547_v11 = vld [vmem:[%s4789_s3 + $0x88] sm:$0xff]   ;;  %v2845_v24 = vcombine.low %v4364_v59, %v4364_v59 }
 0x1fa   : > { %3196 = vmatpush3.bf16.msra.mxu0 %v3530_v37  ;;  %3169 = vmatprep.subr.bf16.mxu1 %v3719_v58  ;;  %v1365_v0 = vrot.slane %v1363_v56, 1  ;;  %v4370_v1 = vcombine.low %v4364_v59, %v1322_v60  ;;  %v3542_v38 = vld [vmem:[%s4789_s3 + $0x38] sm:$0xff]   ;;  %v3545_v2 = vld [vmem:[%s4789_s3 + $0x80] sm:$0xff]   ;;  %v3548_v14 = vld [vmem:[%s4789_s3 + $0xc8] sm:$0xff]   ;;  %v1615_v61 = vrot.slane %v4348_v48, 1  ;;  %s3440_s26 = smul.u32 10, %s3696_s22 }
 0x1fb   : > { %3197 = vmatprep.subr.bf16.mxu0 %v3719_v58  ;;  %v1360_v55 = vrot.slane %v1358_v50, 1  ;;  %v3546_v9 = vld [vmem:[%s4789_s3 + $0xc0] sm:$0xff]   ;;  %v3549_v15 = vld [vmem:[%s4789_s3 + $0x90] sm:$0xff]   ;;  %vm4827_vm2 = vmmov %vm4826_vm5  ;;  %s2659_s17 = scalar_lea.sflag [#allocation6], %s3883_s10  ;;  %s3614_s13 = scalar_lea.vmem %s4730_s21, 640 }
 0x1fc   : > { %v1371_v7 = vshll.u32 %v4370_v1, 16  ;;  %v1369_v17 = vor.u32 %v1367_v5, %v1365_v0  ;;  %v3550_v16 = vld [vmem:[%s4789_s3 + $0xd0] sm:$0xff]   ;;  %v1375_v18 = vshrl.u32 %v4370_v1, 16  ;;  %v3551_v20 = vld [vmem:[%s4789_s3 + $0x98] sm:$0xff]   ;;  %v3554_v23 = vld [vmem:[%s4789_s3 + $0xa0] sm:$0xff]   ;;  %s2671_s27 = sadd.s32 %s3440_s26, %s3439_s14  ;;  %p3615_p3 = scmp.ne.s32.totalorder %s4730_s21, %s3614_s13 }
 0x1fd   : > { %3170 = vmatpush3.bf16.msra.mxu1 %v3531_v63  ;;  %v1361_v62 = vor.u32 %v1360_v55, %v1356_v54  ;;  %v3553_v21 = vld [vmem:[%s4789_s3 + $0xd8] sm:$0xff]   ;;  %v3555_v25 = vld [vmem:[%s4789_s3 + $0xe0] sm:$0xff]   ;;  %v3556_v26 = vld [vmem:[%s4789_s3 + $0xa8] sm:$0xff]   ;;  %s3034_s9 = sshll.u32 %s2671_s27, 7  ;;  %s3721_s11 = smov [#allocation5]  }
 0x1fe   : > { %3198 = vmatpush3.bf16.msra.mxu0 %v3532_v8  ;;  %3171 = vmatprep.subr.bf16.mxu1 %v3719_v58  ;;  %v1373_v12 = vrot.slane %v1371_v7, 1  ;;  %v3557_v27 = vld [vmem:[%s4789_s3 + $0xe8] sm:$0xff]   ;;  %v1593_v6 = vld [vmem:[#allocation3] sm:$0xe]  ;;  %v1731_v30 = vld [vmem:[#allocation3 + $0x4] sm:$0xe]  ;;  %s4728_s15 = scalar_lea.hbm %s4791_s5, %s3034_s9  ;;  %p3616_p4 = pnand %p3615_p3, %p3813_p8 }
 0x1ff   : > { %3199 = vmatprep.subr.bf16.mxu0 %v3719_v58  ;;  %v1366_v3 = vsel %vm4826_vm5, %v1361_v62, %v1365_v0  ;;  %v4440_v32 = vld [vmem:[#allocation3 + $0x8] sm:$0xf]  ;;  %v2870_v28 = vcombine.low %v1593_v6, %v4342_v43  ;;  %v3559_v33 = vld [vmem:[%s4789_s3 + $0xb0] sm:$0xff]   ;;  %v4454_v51 = vld [vmem:[#allocation3 + $0xc] sm:$0xff]   ;;  %s3618_s14 = sshll.u32 %s3721_s11, 4  ;;  %s3619_s14 = int_to_ptr.vmem [resolvable:$false] %s3618_s14 }
 0x200   : > { %v1374_v52 = vsel %vm4827_vm2, %v1369_v17, %v1373_v12  ;;  %v1377_v22 = vor.u32 %v1375_v18, %v1373_v12  ;;  %v4452_v34 = vcombine.low %v1731_v30, %v4440_v32  ;;  %v3560_v10 = vld [vmem:[%s4789_s3 + $0xf0] sm:$0xff]   ;;  %v3561_v35 = vld [vmem:[%s4789_s3 + $0xb8] sm:$0xff]   ;;  %v1770_v4 = vrot.slane %v4454_v51, 1  ;;  %v4471_v31 = vld [vmem:[#allocation3 + $0x14] sm:$0xf]  ;;  %p3617_p5 = pneg %p3616_p4  ;;  %s3620_s26 = scalar_lea.vmem %s3619_s14, 1280 }
 0x201   : > { %3172 = vmatpush3.bf16.msra.mxu1 %v3533_v39  ;;  %v3562_v36 = vld [vmem:[%s4789_s3 + $0xf8] sm:$0xff]   ;;  %v1614_v13 = vrot.slane %v2870_v28, 1  ;;  %v1736_v29 = vld [vmem:[#allocation3 + $0x18] sm:$0x1]  ;;  %v3564_v63 = vld [vmem:[%s4789_s3 + $0x100] sm:$0xff]   ;;  %v1917_v59 = vshrl.u32 %v4454_v51, 16  ;;  %p3621_p6 = scmp.lt.s32.totalorder %s4730_s21, %s3619_s14  ;;  %p3622_p7 = scmp.lt.s32.totalorder %s3620_s26, %s3614_s13 }
 0x202   : > { %3200 = vmatpush3.bf16.msra.mxu0 %v3534_v40  ;;  %3173 = vmatprep.subr.bf16.mxu1 %v3719_v58  ;;  %v1769_v19 = vrot.slane %v4452_v34, 1  ;;  %vm4829_vm10 = vmmov %vm4828_vm1  ;;  %v3567_v39 = vld [vmem:[%s4789_s3 + $0x140] sm:$0xff]   ;;  %v2897_v40 = vcombine.low %v4471_v31, %v1736_v29  ;;  %v3569_v44 = vld [vmem:[%s4789_s3 + $0x148] sm:$0xff]   ;;  %v1909_v56 = vshrl.u32 %v4452_v34, 16 }
 0x203   : > { %3201 = vmatprep.subr.bf16.mxu0 %v3719_v58  ;;  %v1616_v37 = vsel %vm4828_vm1, %v1614_v13, %v1615_v61  ;;  %vm4830_vm11 = vmmov %vm4828_vm1  ;;  %v3574_v50 = vld [vmem:[%s4789_s3 + $0x118] sm:$0xff]   ;;  %v3576_v54 = vld [vmem:[%s4789_s3 + $0x120] sm:$0xff]   ;;  %v1919_v7 = vrot.slane %v1917_v59, 1  ;;  %p3623_p10 = por %p3622_p7, %p3621_p6 }
 0x204   : > { %v1771_v8 = vsel %vm4829_vm10, %v1769_v19, %v1770_v4  ;;  %v1772_v43 = vrot.slane %v2897_v40, 1  ;;  %vm4831_vm12 = vmmov %vm4828_vm1  ;;  %v3577_v55 = vld [vmem:[%s4789_s3 + $0x160] sm:$0xff]   ;;  %v3578_v60 = vld [vmem:[%s4789_s3 + $0x128] sm:$0xff]  }
 0x205   : > { %3174 = vmatpush3.bf16.msra.mxu1 %v3535_v41  ;;  %v3568_v41 = vld [vmem:[%s4789_s3 + $0x108] sm:$0xff]   ;;  %v3582_v12 = vld [vmem:[%s4789_s3 + $0x138] sm:$0xff]   ;;  %vm4833_vm7 = vmmov %vm4832_vm4  ;;  %p3624_p11 = pnand %p3623_p10, %p3617_p5 }
 0x206   : > { %3202 = vmatpush3.bf16.msra.mxu0 %v3536_v42  ;;  %3175 = vmatprep.subr.bf16.mxu1 %v3719_v58  ;;  %v1617_v42 = vrot.slane %v4370_v1, 1  ;;  %v1886_v62 = vld [vmem:[#allocation3 + $0x18] sm:$0x3]  ;;  %v2046_v1 = vld [vmem:[#allocation3 + $0x4] sm:$0xc]  ;;  %v3583_v18 = vld [vmem:[%s4789_s3 + $0x178] sm:$0xff]  }
 0x207   : > { %3203 = vmatprep.subr.bf16.mxu0 %v3719_v58  ;;  %v3579_v0 = vld [vmem:[%s4789_s3 + $0x168] sm:$0xff]   ;;  %v2947_v17 = vcombine.low %v2046_v1, %v4440_v32  ;;  %v4607_v13 = vld [vmem:[#allocation3 + $0xc] sm:$0xf]  ;;  %v3593_v19 = vld [vmem:[%s4789_s3 + $0x1a0] sm:$0xff]  }
 0x208   : > { %v3587_v6 = vld [vmem:[%s4789_s3 + $0x188] sm:$0xff]   ;;  %v4622_v29 = vld [vmem:[#allocation3 + $0x10] sm:$0xff]   ;;  %vm4834_vm8 = vmmov %vm4832_vm4 }
 0x209   : > { %3176 = vmatpush3.bf16.msra.mxu1 %v3537_v45  ;;  %v1618_v45 = vsel %vm4830_vm11, %v1615_v61, %v1617_v42  ;;  %v3588_v32 = vld [vmem:[%s4789_s3 + $0x1c8] sm:$0xff]   ;;  %v3592_v61 = vld [vmem:[%s4789_s3 + $0x1d8] sm:$0xff]   ;;  %v2369_v40 = vshrl.u32 %v4622_v29, 16  ;;  %vm4836_vm0 = vmmov %vm4832_vm4 }
 0x20a   : > { %3204 = vmatpush3.bf16.msra.mxu0 %v3538_v49  ;;  %3177 = vmatprep.subr.bf16.mxu1 %v3719_v58  ;;  %v3573_v49 = vld [vmem:[%s4789_s3 + $0x150] sm:$0xff]   ;;  %vm4837_vm13 = vmmov %vm4835_vm6 }
 0x20b   : > { %3205 = vmatprep.subr.bf16.mxu0 %v3719_v58  ;;  %vm4839_vm15 = vmmov %vm4838_vm14 }
 0x20d   : > { %3178 = vmatpush3.bf16.msra.mxu1 %v3539_v53  ;;  %v3575_v53 = vld [vmem:[%s4789_s3 + $0x158] sm:$0xff]  }
 0x20e   : > { %3206 = vmatpush3.bf16.msra.mxu0 %v3540_v57  ;;  %3179 = vmatprep.subr.bf16.mxu1 %v3719_v58  ;;  %v1912_v57 = vshll.u32 %v4452_v34, 16  ;;  %v3589_v34 = vld [vmem:[%s4789_s3 + $0x190] sm:$0xff]  }
 0x20f   : > { %3207 = vmatprep.subr.bf16.mxu0 %v3719_v58 }
 0x210   : > { %v1914_v5 = vrot.slane %v1912_v57, 2  ;;  %v3600_v57 = vld [vmem:[%s4789_s3 + $0x1f8] sm:$0xff]  }
 0x211   : > { %3180 = vmatpush3.bf16.msra.mxu1 %v3541_v47  ;;  %v1920_v47 = vshll.u32 %v4454_v51, 16 }
 0x212   : > { %3208 = vmatpush3.bf16.msra.mxu0 %v3542_v38  ;;  %3221 = vmatprep.subr.bf16.mxu1 %v3719_v58  ;;  %v1911_v38 = vrot.slane %v1909_v56, 1  ;;  %v2223_v56 = vrot.slane %v4622_v29, 2 }
 0x213   : > { %3249 = vmatprep.subr.bf16.mxu0 %v3719_v58 }
 0x214   : > { %3182 = vmatmul.mubr.bf16.vlgmr.msra.gmra.mrb[0].mxu1 %v1366_v3  ;;  %v3580_v3 = vld [vmem:[%s4789_s3 + $0x130] sm:$0xff]  }
 0x215   : > { %3210 = vmatmul.mubr.bf16.vlgmr.msra.gmra.mrb[8].mxu0 %v2834_v46  ;;  %3222 = vmatpush3.bf16.msra.mxu1 %v3545_v2  ;;  %v3570_v46 = vld [vmem:[%s4789_s3 + $0x110] sm:$0xff]   ;;  %v4545_v2 = vcombine.low %v4471_v31, %v1886_v62  ;;  %v3594_v31 = vld [vmem:[%s4789_s3 + $0x1e0] sm:$0xff]  }
 0x216   : > { %3250 = vmatpush3.bf16.msra.mxu0 %v3546_v9  ;;  %3223 = vmatprep.subr.bf16.mxu1 %v3719_v58  ;;  %v1922_v9 = vrot.slane %v1920_v47, 2  ;;  %v2189_v47 = vld [vmem:[#allocation3 + $0x1c] sm:$0x3] }
 0x217   : > { %3251 = vmatprep.subr.bf16.mxu0 %v3719_v58  ;;  %3185 = vmatprep.mubr.msk.bf16.mxu1 %vm3720_vm3, %v3719_v58  ;;  %v2070_v28 = vrot.slane %v4545_v2, 2 }
 0x218   : > { %3213 = vmatprep.mubr.msk.bf16.mxu0 %vm3720_vm3, %v3719_v58 }
 0x219   : > { %3224 = vmatpush3.bf16.msra.mxu1 %v3547_v11  ;;  %v3581_v11 = vld [vmem:[%s4789_s3 + $0x170] sm:$0xff]  }
 0x21a   : > { %3252 = vmatpush3.bf16.msra.mxu0 %v3548_v14  ;;  %3225 = vmatprep.subr.bf16.mxu1 %v3719_v58  ;;  %v1915_v14 = vor.u32 %v1914_v5, %v1911_v38  ;;  %v3603_v38 = vld [vmem:[%s4789_s3 + $0x200] sm:$0xff]  }
 0x21b   : > { %3253 = vmatprep.subr.bf16.mxu0 %v3719_v58 }
 0x21c   : > { %3186 = vmatmul.mubr.bf16.gmra.mrb[4].mxu1 %v1374_v52  ;;  %v1926_v52 = vshrl.u32 %v4545_v2, 16 }
 0x21d   : > { %3226 = vmatpush3.bf16.msra.mxu1 %v3549_v15  ;;  %3214 = vmatmul.mubr.bf16.gmra.mrb[12].mxu0 %v4348_v48  ;;  %v1773_v48 = vsel %vm4831_vm12, %v1770_v4, %v1772_v43  ;;  %v1923_v15 = vor.u32 %v1922_v9, %v1919_v7  ;;  %v3604_v9 = vld [vmem:[%s4789_s3 + $0x208] sm:$0xff]  }
 0x21e   : > { %3254 = vmatpush3.bf16.msra.mxu0 %v3550_v16  ;;  %3227 = vmatprep.subr.bf16.mxu1 %v3719_v58  ;;  %v1929_v16 = vshll.u32 %v4545_v2, 16 }
 0x21f   : > { %3255 = vmatprep.subr.bf16.mxu0 %v3719_v58  ;;  %3189 = vmatprep.mubr.msk.bf16.mxu1 %vm3720_vm3, %v3719_v58 }
 0x220   : > { %3217 = vmatprep.mubr.msk.bf16.mxu0 %vm3720_vm3, %v3719_v58 }
 0x221   : > { %3228 = vmatpush3.bf16.msra.mxu1 %v3551_v20  ;;  %v2067_v20 = vrot.slane %v2947_v17, 2 }
 0x222   : > { %3256 = vmatpush3.bf16.msra.mxu0 %v3553_v21  ;;  %3229 = vmatprep.subr.bf16.mxu1 %v3719_v58  ;;  %v2068_v21 = vrot.slane %v4454_v51, 2 }
 0x223   : > { %3257 = vmatprep.subr.bf16.mxu0 %v3719_v58 }
 0x224   : > { %3190 = vmatmul.mubr.bf16.gmra.mrb[8].mxu1 %v1377_v22  ;;  %v1924_v22 = vsel %vm1907_vm9, %v1915_v14, %v1923_v15  ;;  %v2071_v51 = vsel %vm4833_vm7, %v2068_v21, %v2070_v28  ;;  %v3607_v14 = vld [vmem:[%s4789_s3 + $0x210] sm:$0xff]  }
 0x225   : > { %3230 = vmatpush3.bf16.msra.mxu1 %v3554_v23  ;;  %3218 = vmatmul.mubr.bf16.gmra.mrb[16].mxu0 %v2845_v24  ;;  %v3584_v23 = vld [vmem:[%s4789_s3 + $0x180] sm:$0xff]   ;;  %v1928_v24 = vrot.slane %v1926_v52, 1  ;;  %v3608_v52 = vld [vmem:[%s4789_s3 + $0x218] sm:$0xff]  }
 0x226   : > { %3258 = vmatpush3.bf16.msra.mxu0 %v3555_v25  ;;  %3231 = vmatprep.subr.bf16.mxu1 %v3719_v58  ;;  %v1931_v25 = vrot.slane %v1929_v16, 2  ;;  %v3609_v16 = vld [vmem:[%s4789_s3 + $0x220] sm:$0xff]  }
 0x227   : > { %3259 = vmatprep.subr.bf16.mxu0 %v3719_v58  ;;  %3237 = vmatprep.mubr.msk.bf16.mxu1 %vm3720_vm3, %v3719_v58 }
 0x228   : > { %3265 = vmatprep.mubr.msk.bf16.mxu0 %vm3720_vm3, %v3719_v58  ;;  %v1932_v30 = vor.u32 %v1931_v25, %v1928_v24  ;;  %v2520_v25 = vrot.slane %v4622_v29, 3 }
 0x229   : > { %3232 = vmatpush3.bf16.msra.mxu1 %v3556_v26  ;;  %v2069_v26 = vsel %vm4832_vm4, %v2067_v20, %v2068_v21  ;;  %v2498_v20 = vld [vmem:[#allocation3 + $0x8] sm:$0x8]  ;;  %v3611_v21 = vld [vmem:[%s4789_s3 + $0x230] sm:$0xff]  }
 0x22a   : > { %3260 = vmatpush3.bf16.msra.mxu0 %v3557_v27  ;;  %3233 = vmatprep.subr.bf16.mxu1 %v3719_v58  ;;  %v3586_v27 = vld [vmem:[%s4789_s3 + $0x1c0] sm:$0xff]  }
 0x22b   : > { %3261 = vmatprep.subr.bf16.mxu0 %v3719_v58 }
 0x22d   : > { %3234 = vmatpush3.bf16.msra.mxu1 %v3559_v33  ;;  %v1933_v33 = vsel %vm1907_vm9, %v1923_v15, %v1932_v30 }
 0x22e   : > { %3262 = vmatpush3.bf16.msra.mxu0 %v3560_v10  ;;  %3235 = vmatprep.subr.bf16.mxu1 %v3719_v58  ;;  %v3590_v10 = vld [vmem:[%s4789_s3 + $0x1d0] sm:$0xff]  }
 0x22f   : > { %3263 = vmatprep.subr.bf16.mxu0 %v3719_v58 }
 0x231   : > { %3236 = vmatpush3.bf16.msra.mxu1 %v3561_v35  ;;  %v3591_v35 = vld [vmem:[%s4789_s3 + $0x198] sm:$0xff]  }
 0x232   : > { %3264 = vmatpush3.bf16.msra.mxu0 %v3562_v36  ;;  %3277 = vmatprep.subr.bf16.mxu1 %v3719_v58  ;;  %v2184_v36 = vld [vmem:[#allocation3 + $0x8] sm:$0xc] }
 0x233   : > { %3305 = vmatprep.subr.bf16.mxu0 %v3719_v58  ;;  %v2972_v4 = vcombine.low %v2184_v36, %v4607_v13 }
 0x234   : > { %3238 = vmatmul.mubr.bf16.vlgmr.msra.gmra.mrb[12].mxu1 %v1616_v37  ;;  %v3595_v37 = vld [vmem:[%s4789_s3 + $0x1a8] sm:$0xff]  }
 0x235   : > { %3278 = vmatpush3.bf16.msra.mxu1 %v3564_v63  ;;  %3266 = vmatmul.mubr.bf16.vlgmr.msra.gmra.mrb[20].mxu0 %v1771_v8  ;;  %v2361_v63 = vshrl.u32 %v2972_v4, 16  ;;  %v3596_v8 = vld [vmem:[%s4789_s3 + $0x1e8] sm:$0xff]  }
 0x236   : > { %3306 = vmatpush3.bf16.msra.mxu0 %v3567_v39  ;;  %3279 = vmatprep.subr.bf16.mxu1 %v3719_v58  ;;  %v2364_v39 = vshll.u32 %v2972_v4, 16 }
 0x237   : > { %3307 = vmatprep.subr.bf16.mxu0 %v3719_v58  ;;  %3241 = vmatprep.mubr.msk.bf16.mxu1 %vm3720_vm3, %v3719_v58 }
 0x238   : > { %3269 = vmatprep.mubr.msk.bf16.mxu0 %vm3720_vm3, %v3719_v58 }
 0x239   : > { %3280 = vmatpush3.bf16.msra.mxu1 %v3568_v41  ;;  %v2372_v41 = vshll.u32 %v4622_v29, 16 }
 0x23a   : > { %3308 = vmatpush3.bf16.msra.mxu0 %v3569_v44  ;;  %3281 = vmatprep.subr.bf16.mxu1 %v3719_v58  ;;  %v2339_v44 = vld [vmem:[#allocation3 + $0x1c] sm:$0x7] }
 0x23b   : > { %3309 = vmatprep.subr.bf16.mxu0 %v3719_v58 }
 0x23c   : > { %3242 = vmatmul.mubr.bf16.gmra.mrb[16].mxu1 %v1618_v45  ;;  %v2363_v45 = vrot.slane %v2361_v63, 2 }
 0x23d   : > { %3282 = vmatpush3.bf16.msra.mxu1 %v3570_v46  ;;  %3270 = vmatmul.mubr.bf16.gmra.mrb[24].mxu0 %v1773_v48  ;;  %v3598_v46 = vld [vmem:[%s4789_s3 + $0x1f0] sm:$0xff]   ;;  %v2366_v48 = vrot.slane %v2364_v39, 3 }
 0x23e   : > { %3310 = vmatpush3.bf16.msra.mxu0 %v3573_v49  ;;  %3283 = vmatprep.subr.bf16.mxu1 %v3719_v58  ;;  %v2371_v49 = vrot.slane %v2369_v40, 2 }
 0x23f   : > { %3311 = vmatprep.subr.bf16.mxu0 %v3719_v58  ;;  %3245 = vmatprep.mubr.msk.bf16.mxu1 %vm3720_vm3, %v3719_v58  ;;  %v2367_v59 = vor.u32 %v2366_v48, %v2363_v45 }
 0x240   : > { %3273 = vmatprep.mubr.msk.bf16.mxu0 %vm3720_vm3, %v3719_v58 }
 0x241   : > { %3284 = vmatpush3.bf16.msra.mxu1 %v3574_v50  ;;  %v2374_v50 = vrot.slane %v2372_v41, 3 }
 0x242   : > { %3312 = vmatpush3.bf16.msra.mxu0 %v3575_v53  ;;  %3285 = vmatprep.subr.bf16.mxu1 %v3719_v58 }
 0x243   : > { %3313 = vmatprep.subr.bf16.mxu0 %v3719_v58 }
 0x244   : > { %3246 = vmatmul.mubr.bf16.gmra.mrb[20].mxu1 %v1617_v42  ;;  %v2188_v42 = vld [vmem:[#allocation3 + $0x18] sm:$0xf] }
 0x245   : > { %3286 = vmatpush3.bf16.msra.mxu1 %v3576_v54  ;;  %3274 = vmatmul.mubr.bf16.gmra.mrb[28].mxu0 %v1772_v43  ;;  %v3597_v43 = vld [vmem:[%s4789_s3 + $0x1b0] sm:$0xff]   ;;  %v4646_v53 = vcombine.low %v2188_v42, %v2339_v44  ;;  %v3599_v54 = vld [vmem:[%s4789_s3 + $0x1b8] sm:$0xff]   ;;  %v2974_v2 = vcombine.low %v2188_v42, %v2189_v47 }
 0x246   : > { %3314 = vmatpush3.bf16.msra.mxu0 %v3577_v55  ;;  %3287 = vmatprep.subr.bf16.mxu1 %v3719_v58  ;;  %v2222_v55 = vrot.slane %v2972_v4, 2 }
 0x247   : > { %3315 = vmatprep.subr.bf16.mxu0 %v3719_v58  ;;  %3293 = vmatprep.mubr.msk.bf16.mxu1 %vm3720_vm3, %v3719_v58  ;;  %v2378_v62 = vshrl.u32 %v4646_v53, 16 }
 0x248   : > { %3321 = vmatprep.mubr.msk.bf16.mxu0 %vm3720_vm3, %v3719_v58  ;;  %v2224_v1 = vsel %vm4834_vm8, %v2222_v55, %v2223_v56 }
 0x249   : > { %3288 = vmatpush3.bf16.msra.mxu1 %v3578_v60  ;;  %v2375_v60 = vor.u32 %v2374_v50, %v2371_v49  ;;  %v2380_v5 = vrot.slane %v2378_v62, 2 }
 0x24a   : > { %3316 = vmatpush3.bf16.msra.mxu0 %v3579_v0  ;;  %3289 = vmatprep.subr.bf16.mxu1 %v3719_v58  ;;  %v2381_v0 = vshll.u32 %v4646_v53, 16 }
 0x24b   : > { %3317 = vmatprep.subr.bf16.mxu0 %v3719_v58 }
 0x24c   : > { %v2383_v7 = vrot.slane %v2381_v0, 3 }
 0x24d   : > { %3290 = vmatpush3.bf16.msra.mxu1 %v3580_v3  ;;  %v2376_v3 = vsel %vm4835_vm6, %v2367_v59, %v2375_v60 }
 0x24e   : > { %3318 = vmatpush3.bf16.msra.mxu0 %v3581_v11  ;;  %3291 = vmatprep.subr.bf16.mxu1 %v3719_v58  ;;  %v2225_v11 = vrot.slane %v2974_v2, 2  ;;  %v2384_v17 = vor.u32 %v2383_v7, %v2380_v5 }
 0x24f   : > { %3319 = vmatprep.subr.bf16.mxu0 %v3719_v58 }
 0x250   : > { %v2385_v15 = vsel %vm4837_vm13, %v2375_v60, %v2384_v17 }
 0x251   : > { %3292 = vmatpush3.bf16.msra.mxu1 %v3582_v12  ;;  %v2226_v12 = vsel %vm4836_vm0, %v2223_v56, %v2225_v11 }
 0x252   : > { %3320 = vmatpush3.bf16.msra.mxu0 %v3583_v18  ;;  %3333 = vmatprep.subr.bf16.mxu1 %v3719_v58  ;;  %v3610_v18 = vld [vmem:[%s4789_s3 + $0x228] sm:$0xff]  }
 0x253   : > { %3361 = vmatprep.subr.bf16.mxu0 %v3719_v58 }
 0x254   : > { %3294 = vmatmul.mubr.bf16.vlgmr.msra.gmra.mrb[24].mxu1 %v1924_v22  ;;  %v3024_v22 = vcombine.low %v2498_v20, %v4607_v13 }
 0x255   : > { %3334 = vmatpush3.bf16.msra.mxu1 %v3584_v23  ;;  %3322 = vmatmul.mubr.bf16.vlgmr.msra.gmra.mrb[32].mxu0 %v2069_v26  ;;  %v3612_v23 = vld [vmem:[%s4789_s3 + $0x238] sm:$0xff]  }
 0x256   : > { %3362 = vmatpush3.bf16.msra.mxu0 %v3586_v27  ;;  %3335 = vmatprep.subr.bf16.mxu1 %v3719_v58  ;;  %v2519_v24 = vrot.slane %v3024_v22, 3  ;;  %v2522_v27 = vrot.slane %v4646_v53, 3 }
 0x257   : > { %3363 = vmatprep.subr.bf16.mxu0 %v3719_v58  ;;  %3297 = vmatprep.mubr.msk.bf16.mxu1 %vm3720_vm3, %v3719_v58 }
 0x258   : > { %3325 = vmatprep.mubr.msk.bf16.mxu0 %vm3720_vm3, %v3719_v58  ;;  %v2521_v26 = vsel %vm4838_vm14, %v2519_v24, %v2520_v25 }
 0x259   : > { %3336 = vmatpush3.bf16.msra.mxu1 %v3587_v6  ;;  %v2523_v6 = vsel %vm4839_vm15, %v2520_v25, %v2522_v27 }
 0x25a   : > { %3364 = vmatpush3.bf16.msra.mxu0 %v3588_v32  ;;  %3337 = vmatprep.subr.bf16.mxu1 %v3719_v58 }
 0x25b   : > { %3365 = vmatprep.subr.bf16.mxu0 %v3719_v58 }
 0x25c   : > { %3298 = vmatmul.mubr.bf16.gmra.mrb[28].mxu1 %v1933_v33 }
 0x25d   : > { %3338 = vmatpush3.bf16.msra.mxu1 %v3589_v34  ;;  %3326 = vmatmul.mubr.bf16.gmra.mrb[36].mxu0 %v2071_v51 }
 0x25e   : > { %3366 = vmatpush3.bf16.msra.mxu0 %v3590_v10  ;;  %3339 = vmatprep.subr.bf16.mxu1 %v3719_v58 }
 0x25f   : > { %3367 = vmatprep.subr.bf16.mxu0 %v3719_v58  ;;  %3301 = vmatprep.mubr.msk.bf16.mxu1 %vm3720_vm3, %v3719_v58 }
 0x260   : > { %3329 = vmatprep.mubr.msk.bf16.mxu0 %vm3720_vm3, %v3719_v58 }
 0x261   : > { %3340 = vmatpush3.bf16.msra.mxu1 %v3591_v35 }
 0x262   : > { %3368 = vmatpush3.bf16.msra.mxu0 %v3592_v61  ;;  %3341 = vmatprep.subr.bf16.mxu1 %v3719_v58 }
 0x263   : > { %3369 = vmatprep.subr.bf16.mxu0 %v3719_v58 }
 0x264   : > { %3302 = vmatmul.mubr.bf16.gmra.mrb[32].mxu1 %v1932_v30 }
 0x265   : > { %3342 = vmatpush3.bf16.msra.mxu1 %v3593_v19  ;;  %3330 = vmatmul.mubr.bf16.gmra.mrb[40].mxu0 %v2070_v28 }
 0x266   : > { %3370 = vmatpush3.bf16.msra.mxu0 %v3594_v31  ;;  %3343 = vmatprep.subr.bf16.mxu1 %v3719_v58 }
 0x267   : > { %3371 = vmatprep.subr.bf16.mxu0 %v3719_v58  ;;  %3349 = vmatprep.mubr.msk.bf16.mxu1 %vm3720_vm3, %v3719_v58 }
 0x268   : > { %3377 = vmatprep.mubr.msk.bf16.mxu0 %vm3720_vm3, %v3719_v58 }
 0x269   : > { %3344 = vmatpush3.bf16.msra.mxu1 %v3595_v37 }
 0x26a   : > { %3372 = vmatpush3.bf16.msra.mxu0 %v3596_v8  ;;  %3345 = vmatprep.subr.bf16.mxu1 %v3719_v58 }
 0x26b   : > { %3373 = vmatprep.subr.bf16.mxu0 %v3719_v58 }
 0x26d   : > { %3346 = vmatpush3.bf16.msra.mxu1 %v3597_v43 }
 0x26e   : > { %3374 = vmatpush3.bf16.msra.mxu0 %v3598_v46  ;;  %3347 = vmatprep.subr.bf16.mxu1 %v3719_v58 }
 0x26f   : > { %3375 = vmatprep.subr.bf16.mxu0 %v3719_v58 }
 0x271   : > { %3348 = vmatpush3.bf16.msra.mxu1 %v3599_v54 }
 0x272   : > { %3376 = vmatpush3.bf16.msra.mxu0 %v3600_v57  ;;  %3389 = vmatprep.subr.bf16.mxu1 %v3719_v58 }
 0x274   : > { %3350 = vmatmul.mubr.bf16.vlgmr.msra.gmra.mrb[36].mxu1 %v2224_v1 }
 0x275   : > { %3390 = vmatpush3.bf16.msra.mxu1 %v3603_v38  ;;  %3378 = vmatmul.mubr.bf16.vlgmr.msra.gmra.mrb[44].mxu0 %v2376_v3 }
 0x276   : > { %3391 = vmatprep.subr.bf16.mxu1 %v3719_v58  ;;  %3353 = vmatprep.mubr.msk.bf16.mxu1 %vm3720_vm3, %v3719_v58 }
 0x277   : > { %3381 = vmatprep.mubr.msk.bf16.mxu0 %vm3720_vm3, %v3719_v58 }
 0x279   : > { %3392 = vmatpush3.bf16.msra.mxu1 %v3604_v9 }
 0x27a   : > { %3393 = vmatprep.subr.bf16.mxu1 %v3719_v58 }
 0x27c   : > { %3354 = vmatmul.mubr.bf16.gmra.mrb[40].mxu1 %v2226_v12 }
 0x27d   : > { %3394 = vmatpush3.bf16.msra.mxu1 %v3607_v14  ;;  %3382 = vmatmul.mubr.bf16.gmra.mrb[48].mxu0 %v2385_v15 }
 0x27e   : > { %3395 = vmatprep.subr.bf16.mxu1 %v3719_v58  ;;  %3357 = vmatprep.mubr.msk.bf16.mxu1 %vm3720_vm3, %v3719_v58 }
 0x27f   : > { %3385 = vmatprep.mubr.msk.bf16.mxu0 %vm3720_vm3, %v3719_v58 }
 0x281   : > { %3396 = vmatpush3.bf16.msra.mxu1 %v3608_v52 }
 0x282   : > { %3397 = vmatprep.subr.bf16.mxu1 %v3719_v58 }
 0x284   : > { %3358 = vmatmul.mubr.bf16.gmra.mrb[44].mxu1 %v2225_v11 }
 0x285   : > { %3398 = vmatpush3.bf16.msra.mxu1 %v3609_v16  ;;  %3386 = vmatmul.mubr.bf16.gmra.mrb[52].mxu0 %v2384_v17 }
 0x286   : > { %3399 = vmatprep.subr.bf16.mxu1 %v3719_v58  ;;  %3405 = vmatprep.mubr.msk.bf16.mxu1 %vm3720_vm3, %v3719_v58 }
 0x289   : > { %3400 = vmatpush3.bf16.msra.mxu1 %v3610_v18 }
 0x28a   : > { %3401 = vmatprep.subr.bf16.mxu1 %v3719_v58 }
 0x28d   : > { %3402 = vmatpush3.bf16.msra.mxu1 %v3611_v21 }
 0x28e   : > { %3403 = vmatprep.subr.bf16.mxu1 %v3719_v58 }
 0x291   : > { %3404 = vmatpush3.bf16.msra.mxu1 %v3612_v23 }
 0x294   : > { %3406 = vmatmul.mubr.bf16.vlgmr.msra.gmra.mrb[48].mxu1 %v2521_v26 }
 0x295   : > { %3409 = vmatprep.mubr.msk.bf16.mxu1 %vm3720_vm3, %v3719_v58 }
 0x29c   : > { %3410 = vmatmul.mubr.bf16.gmra.mrb[52].mxu1 %v2523_v6 }
 0x29d   : > { %3413 = vmatprep.mubr.msk.bf16.mxu1 %vm3720_vm3, %v3719_v58 }
 0x2a4   : > { %3414 = vmatmul.mubr.bf16.gmra.mrb[56].mxu1 %v2522_v27 }
 0x2e7   : > { %v1463_v30 = vpop.f32.mrb[0].mxu1 }
 0x2e8   : > { %v1571_v32 = vpop.f32.mrb[8].mxu0  ;;  %v3183_v28 = vpop.f32.mrb[1].mxu1 }
 0x2e9   : > { %v1572_v33 = vadd.f32 %v1571_v32, %v1463_v30  ;;  %v3211_v34 = vpop.f32.mrb[9].mxu0  ;;  %v1466_v51 = vpop.f32.mrb[2].mxu1 }
 0x2ea   : > { %v1574_v10 = vpop.f32.mrb[10].mxu0  ;;  %v3184_v35 = vpop.f32.mrb[3].mxu1 }
 0x2eb   : > { %v1575_v61 = vadd.f32 %v1574_v10, %v1466_v51  ;;  %v3212_v36 = vpop.f32.mrb[11].mxu0 }
 0x2ef   : > { %v1471_v13 = vpop.f32.mrb[4].mxu1 }
 0x2f0   : > { %v3187_v19 = vpop.f32.mrb[5].mxu1  ;;  %v1579_v4 = vpop.f32.mrb[12].mxu0 }
 0x2f1   : > { %v1580_v31 = vadd.f32 %v1579_v4, %v1471_v13  ;;  %v1474_v29 = vpop.f32.mrb[6].mxu1  ;;  %v3215_v37 = vpop.f32.mrb[13].mxu0 }
 0x2f2   : > { %v3188_v63 = vpop.f32.mrb[7].mxu1  ;;  %v1582_v8 = vpop.f32.mrb[14].mxu0 }
 0x2f3   : > { %v1583_v58 = vadd.f32 %v1582_v8, %v1474_v29  ;;  %v3216_v39 = vpop.f32.mrb[15].mxu0 }
 0x2f7   : > { %v1479_v40 = vpop.f32.mrb[8].mxu1 }
 0x2f8   : > { %v3191_v41 = vpop.f32.mrb[9].mxu1  ;;  %v1587_v42 = vpop.f32.mrb[16].mxu0 }
 0x2f9   : > { %v1482_v44 = vpop.f32.mrb[10].mxu1  ;;  %v1588_v43 = vadd.f32 %v1587_v42, %v1479_v40  ;;  %v3219_v45 = vpop.f32.mrb[17].mxu0 }
 0x2fa   : > { %v3192_v46 = vpop.f32.mrb[11].mxu1  ;;  %v1590_v48 = vpop.f32.mrb[18].mxu0 }
 0x2fb   : > { %v3220_v49 = vpop.f32.mrb[19].mxu0 }
 0x307   : > { %v1704_v50 = vpop.f32.mrb[12].mxu1 }
 0x308   : > { %v1726_v53 = vadd.f32 %v1704_v50, %v1572_v33  ;;  %v3239_v54 = vpop.f32.mrb[13].mxu1  ;;  %v1859_v55 = vpop.f32.mrb[20].mxu0 }
 0x309   : > { %v1707_v56 = vpop.f32.mrb[14].mxu1  ;;  %v3267_v57 = vpop.f32.mrb[21].mxu0 }
 0x30a   : > { %v1727_v59 = vadd.f32 %v1707_v56, %v1575_v61  ;;  %v1881_v60 = vadd.f32 %v1859_v55, %v1726_v53  ;;  %v3240_v47 = vpop.f32.mrb[15].mxu1  ;;  %v1862_v62 = vpop.f32.mrb[22].mxu0 }
 0x30b   : > { %v3268_v0 = vpop.f32.mrb[23].mxu0 }
 0x30c   : > { %v1882_v1 = vadd.f32 %v1862_v62, %v1727_v59 }
 0x30f   : > { %v1712_v38 = vpop.f32.mrb[16].mxu1 }
 0x310   : > { %v1728_v2 = vadd.f32 %v1712_v38, %v1580_v31  ;;  %v3243_v3 = vpop.f32.mrb[17].mxu1  ;;  %v1867_v5 = vpop.f32.mrb[24].mxu0 }
 0x311   : > { %v1715_v7 = vpop.f32.mrb[18].mxu1  ;;  %v3271_v9 = vpop.f32.mrb[25].mxu0 }
 0x312   : > { %v1729_v11 = vadd.f32 %v1715_v7, %v1583_v58  ;;  %v1883_v17 = vadd.f32 %v1867_v5, %v1728_v2  ;;  %v1870_v12 = vpop.f32.mrb[26].mxu0  ;;  %v3244_v14 = vpop.f32.mrb[19].mxu1 }
 0x313   : > { %v3272_v15 = vpop.f32.mrb[27].mxu0 }
 0x314   : > { %v1884_v52 = vadd.f32 %v1870_v12, %v1729_v11 }
 0x317   : > { %v1720_v16 = vpop.f32.mrb[20].mxu1 }
 0x318   : > { %v1730_v18 = vadd.f32 %v1720_v16, %v1588_v43  ;;  %v1875_v20 = vpop.f32.mrb[28].mxu0  ;;  %v3247_v21 = vpop.f32.mrb[21].mxu1 }
 0x319   : > { %v1723_v22 = vpop.f32.mrb[22].mxu1  ;;  %v3275_v23 = vpop.f32.mrb[29].mxu0 }
 0x31a   : > { %v1885_v24 = vadd.f32 %v1875_v20, %v1730_v18  ;;  %v3248_v25 = vpop.f32.mrb[23].mxu1  ;;  %v1878_v26 = vpop.f32.mrb[30].mxu0 }
 0x31b   : > { %v3276_v27 = vpop.f32.mrb[31].mxu0 }
 0x327   : > { %v2019_v6 = vpop.f32.mrb[24].mxu1 }
 0x328   : > { %v2041_v30 = vadd.f32 %v2019_v6, %v1881_v60  ;;  %v3295_v32 = vpop.f32.mrb[25].mxu1  ;;  %v2157_v28 = vpop.f32.mrb[32].mxu0 }
 0x329   : > { %v2022_v33 = vpop.f32.mrb[26].mxu1  ;;  %v3323_v34 = vpop.f32.mrb[33].mxu0 }
 0x32a   : > { %v2042_v51 = vadd.f32 %v2022_v33, %v1882_v1  ;;  %v2179_v10 = vadd.f32 %v2157_v28, %v2041_v30  ;;  %v3296_v35 = vpop.f32.mrb[27].mxu1  ;;  %v2160_v61 = vpop.f32.mrb[34].mxu0  ;;  %v3033_v34 = vld [vmem:[%s4790_s4] ss:$0 sm:$0xff] }
 0x32b   : > { %v3324_v36 = vpop.f32.mrb[35].mxu0 }
 0x32c   : > { %v2180_v13 = vadd.f32 %v2160_v61, %v2042_v51 }
 0x32f   : > { %v2027_v19 = vpop.f32.mrb[28].mxu1 }
 0x330   : > { %v2043_v4 = vadd.f32 %v2027_v19, %v1883_v17  ;;  %v3299_v31 = vpop.f32.mrb[29].mxu1  ;;  %v2165_v29 = vpop.f32.mrb[36].mxu0 }
 0x331   : > { %v2030_v37 = vpop.f32.mrb[30].mxu1  ;;  %v3327_v63 = vpop.f32.mrb[37].mxu0 }
 0x332   : > { %v2044_v8 = vadd.f32 %v2030_v37, %v1884_v52  ;;  %v2181_v58 = vadd.f32 %v2165_v29, %v2043_v4  ;;  %v2168_v39 = vpop.f32.mrb[38].mxu0  ;;  %v3300_v40 = vpop.f32.mrb[31].mxu1 }
 0x333   : > { %v3328_v41 = vpop.f32.mrb[39].mxu0 }
 0x334   : > { %v2182_v42 = vadd.f32 %v2168_v39, %v2044_v8 }
 0x337   : > { %v2035_v44 = vpop.f32.mrb[32].mxu1 }
 0x338   : > { %v2045_v43 = vadd.f32 %v2035_v44, %v1885_v24  ;;  %v2173_v45 = vpop.f32.mrb[40].mxu0  ;;  %v3303_v46 = vpop.f32.mrb[33].mxu1 }
 0x339   : > { %v2038_v48 = vpop.f32.mrb[34].mxu1  ;;  %v3331_v49 = vpop.f32.mrb[41].mxu0 }
 0x33a   : > { %v2183_v50 = vadd.f32 %v2173_v45, %v2045_v43  ;;  %v3304_v53 = vpop.f32.mrb[35].mxu1  ;;  %v2176_v54 = vpop.f32.mrb[42].mxu0 }
 0x33b   : > { %v3332_v55 = vpop.f32.mrb[43].mxu0 }
 0x347   : > { %v2312_v56 = vpop.f32.mrb[36].mxu1 }
 0x348   : > { %v2334_v57 = vadd.f32 %v2312_v56, %v2179_v10  ;;  %v3351_v59 = vpop.f32.mrb[37].mxu1  ;;  %v2471_v60 = vpop.f32.mrb[44].mxu0 }
 0x349   : > { %v2315_v47 = vpop.f32.mrb[38].mxu1  ;;  %v3379_v62 = vpop.f32.mrb[45].mxu0 }
 0x34a   : > { %v2335_v0 = vadd.f32 %v2315_v47, %v2180_v13  ;;  %v2493_v1 = vadd.f32 %v2471_v60, %v2334_v57  ;;  %v3352_v38 = vpop.f32.mrb[39].mxu1  ;;  %v2474_v2 = vpop.f32.mrb[46].mxu0 }
 0x34b   : > { %v3380_v3 = vpop.f32.mrb[47].mxu0 }
 0x34c   : > { %v2494_v5 = vadd.f32 %v2474_v2, %v2335_v0 }
 0x34f   : > { %v2320_v7 = vpop.f32.mrb[40].mxu1 }
 0x350   : > { %v2336_v9 = vadd.f32 %v2320_v7, %v2181_v58  ;;  %v3355_v11 = vpop.f32.mrb[41].mxu1  ;;  %v2479_v17 = vpop.f32.mrb[48].mxu0 }
 0x351   : > { %v2323_v12 = vpop.f32.mrb[42].mxu1  ;;  %v3383_v14 = vpop.f32.mrb[49].mxu0 }
 0x352   : > { %v2337_v15 = vadd.f32 %v2323_v12, %v2182_v42  ;;  %v2495_v52 = vadd.f32 %v2479_v17, %v2336_v9  ;;  %v2482_v16 = vpop.f32.mrb[50].mxu0  ;;  %v3356_v18 = vpop.f32.mrb[43].mxu1 }
 0x353   : > { %v3384_v20 = vpop.f32.mrb[51].mxu0 }
 0x354   : > { %v2496_v21 = vadd.f32 %v2482_v16, %v2337_v15 }
 0x357   : > { %v2328_v22 = vpop.f32.mrb[44].mxu1 }
 0x358   : > { %v2338_v23 = vadd.f32 %v2328_v22, %v2183_v50  ;;  %v2487_v24 = vpop.f32.mrb[52].mxu0  ;;  %v3359_v25 = vpop.f32.mrb[45].mxu1 }
 0x359   : > { %v2331_v26 = vpop.f32.mrb[46].mxu1  ;;  %v3387_v27 = vpop.f32.mrb[53].mxu0 }
 0x35a   : > { %v2497_v6 = vadd.f32 %v2487_v24, %v2338_v23  ;;  %v3360_v30 = vpop.f32.mrb[47].mxu1  ;;  %v2490_v32 = vpop.f32.mrb[54].mxu0 }
 0x35b   : > { %v3388_v28 = vpop.f32.mrb[55].mxu0 }
 0x367   : > { %v2609_v33 = vpop.f32.mrb[48].mxu1 }
 0x368   : > { %v2631_v51 = vadd.f32 %v2609_v33, %v2493_v1  ;;  %v3407_v10 = vpop.f32.mrb[49].mxu1 }
 0x369   : > { %v2612_v35 = vpop.f32.mrb[50].mxu1 }
 0x36a   : > { %v2643_v61 = vadd.f32 %v3033_v34, %v2631_v51  ;;  %v2632_v36 = vadd.f32 %v2612_v35, %v2494_v5  ;;  %v3408_v13 = vpop.f32.mrb[51].mxu1 }
 0x36c   : > { %v2648_v19 = vmax.f32 %v2643_v61, 0.0  ;;  %v2644_v4 = vadd.f32 %v3033_v34, %v2632_v36 }
 0x36e   : > { %2653 = vst [vmem:[%s4289_s30] sm:$0xff] %v2648_v19  ;;  %v2649_v31 = vmax.f32 %v2644_v4, 0.0 }
 0x36f   : > { %v2617_v29 = vpop.f32.mrb[52].mxu1 }
 0x370   : > { %2654 = vst [vmem:[%s4289_s30 + $0x8] sm:$0xff] %v2649_v31  ;;  %v2633_v37 = vadd.f32 %v2617_v29, %v2495_v52  ;;  %v3411_v63 = vpop.f32.mrb[53].mxu1 }
 0x371   : > { %v2620_v8 = vpop.f32.mrb[54].mxu1 }
 0x372   : > { %v2645_v58 = vadd.f32 %v3033_v34, %v2633_v37  ;;  %v2634_v39 = vadd.f32 %v2620_v8, %v2496_v21  ;;  %v3412_v40 = vpop.f32.mrb[55].mxu1 }
 0x374   : > { %v2650_v41 = vmax.f32 %v2645_v58, 0.0  ;;  %v2646_v42 = vadd.f32 %v3033_v34, %v2634_v39 }
 0x376   : > { %2655 = vst [vmem:[%s4289_s30 + $0x10] sm:$0xff] %v2650_v41  ;;  %v2651_v44 = vmax.f32 %v2646_v42, 0.0 }
 0x377   : > { %v2625_v43 = vpop.f32.mrb[56].mxu1 }
 0x378   : > { %2656 = vst [vmem:[%s4289_s30 + $0x18] sm:$0xff] %v2651_v44  ;;  %v2635_v45 = vadd.f32 %v2625_v43, %v2497_v6  ;;  %v3415_v46 = vpop.f32.mrb[57].mxu1 }
 0x379   : > { %v2628_v48 = vpop.f32.mrb[58].mxu1 }
 0x37a   : > { %v2647_v49 = vadd.f32 %v3033_v34, %v2635_v45  ;;  %v3416_v50 = vpop.f32.mrb[59].mxu1 }
 0x37c   : > { %v2652_v53 = vmax.f32 %v2647_v49, 0.0 }
 0x37e   : > { %2657 = vst [vmem:[%s4289_s30 + $0x20] sm:$0xff] %v2652_v53 }
 0x37f   : > { %3627 = shalt.err (!%p3624_p11)
}
 0x380   : > { %s3628_s30 = scalar_lea.hbm %s4728_s15, 640  ;;  %s3632_s22 = scalar_lea.hbm %s4791_s5, 2560 }
 0x381   : > { %p3629_p12 = scmp.ne.s32.totalorder %s4728_s15, %s3628_s30  ;;  %p3633_p1 = scmp.lt.u32.totalorder %s4728_s15, %s4791_s5 }
 0x382   : > { %p3634_p2 = scmp.lt.u32.totalorder %s3632_s22, %s3628_s30  ;;  %p3636_p4 = scmp.lt.u32.totalorder %s3628_s30, %s4728_s15 }
 0x383   : > { %p3630_p13 = pnand %p3629_p12, %p3813_p8 }
 0x384   : > { %p3635_p3 = por %p3634_p2, %p3633_p1 }
 0x385   : > { %p3631_p0 = pneg %p3630_p13 }
 0x386   : > { %p3637_p5 = por %p3636_p4, %p3635_p3 }
 0x388   : > { %p3638_p6 = pnand %p3637_p5, %p3631_p0 }
 0x38a   : > { %3641 = shalt.err (!%p3638_p6)
}
 0x38b   : > { %s3722_s13 = smov 128  }
 0x38c   : > { %3441 = dma.vmem_to_hbm [thread:$0]  (%p3813_p8), %s4730_s21, 640, %s4728_s15, %s2659_s17, %s3722_s13, %s3722_s13, %s3712_s16  }
 0x38d PF: > { %p3447_p7 = scmp.ge.s32.totalorder %s3708_s25, 2  ;;  %s2689_s14 = sand.u32 1, %s3680_s18  }
 0x38e   : > { %s2690_s26 = scalar_lea.sflag [#allocation6], %s2689_s14 }
 0x38f   : > { %p3444_p10 = pnand %p3447_p7, %p3817_p9 }
 0x391   : > { %3675 = dma.done.wait (!%p3444_p10), %s2690_s26, 640  }
 0x392   : > { %3677 = vsyncadd (!%p3444_p10), %s2690_s26, 4294966656  ;;  %s18_s25 = sadd.s32 1, %s3708_s25   ;;  %s4840_s18 = smov %s3684_s19 }
 0x393   : > { %p15_p11 = scmp.ge.s32.totalorder %s18_s25, 6   ;;  %s4841_s19 = smov %s3688_s20 }
 0x394   : > { %s4842_s20 = smov %s3825_s12  ;;  %s4843_s21 = smov %s3700_s23 }
 0x395   : > { %s4844_s22 = smov %s3704_s24  ;;  %s4845_s23 = smov %s4848_s28 }
 0x396   : > { %s4846_s24 = smov %s4852_s29  ;;  %17 = sbr.rel (!%p15_p11) target bundleno = 5 (0x5), region = 140 }
 0x39d   :  { %2695 = vsyncpa [#allocation6], 1 }
 0x39e   :  { %2697 = vsyncpa [#allocation6 + $0x1], 1 }

</bundles_post_ra>
